<compile_context>
chip_gen: v7x
topology: tpu7x:2x2x1
jax: 0.10.0
libtpu: 0.0.40
codegen_flags: <defaults>
</compile_context>

<pallas_src>
import math

import jax
import jax.numpy as jnp
from jax.experimental import pallas as pl
from jax.experimental.pallas import tpu as pltpu


# ---------------------------------------------------------------------------
# tiling helper
# ---------------------------------------------------------------------------

def _pick_tile(dim, target, step):
    """Largest multiple of `step` that divides `dim` and is <= `target`.
    Falls back to the full dim (always legal: block == full array dim)."""
    if dim <= target:
        return dim
    t = (target // step) * step
    while t >= step:
        if dim % t == 0:
            return t
        t -= step
    return dim


# ---------------------------------------------------------------------------
# Pallas kernels
# ---------------------------------------------------------------------------

def pallas_patch_embed(x_unf, w, bias, pos_emb):
    """Patch-embedding matmul with bias + positional embedding fused in.

    x_unf:   (bv, npatch, Kp) f32 unfolded patches
    w:       (Kp, W)          bf16
    bias:    (W,)             f32
    pos_emb: (npatch, W)      f32
    returns  (bv, npatch, W)  f32 tokens
    """
    bv, npatch, kp = x_unf.shape
    width = w.shape[1]
    tp = _pick_tile(npatch, 256, 8)
    tn = _pick_tile(width, 512, 128)
    b2 = bias.reshape(1, width).astype(jnp.float32)

    def kernel(x_ref, w_ref, b_ref, p_ref, o_ref):
        y = jnp.dot(x_ref[0].astype(jnp.bfloat16), w_ref[...],
                    preferred_element_type=jnp.float32)
        o_ref[0] = y + b_ref[...] + p_ref[...]

    return pl.pallas_call(
        kernel,
        out_shape=jax.ShapeDtypeStruct((bv, npatch, width), jnp.float32),
        grid=(bv, npatch // tp, width // tn),
        in_specs=[
            pl.BlockSpec((1, tp, kp), lambda b, j, n: (b, j, 0)),
            pl.BlockSpec((kp, tn), lambda b, j, n: (0, n)),
            pl.BlockSpec((1, tn), lambda b, j, n: (0, n)),
            pl.BlockSpec((tp, tn), lambda b, j, n: (j, n)),
        ],
        out_specs=pl.BlockSpec((1, tp, tn), lambda b, j, n: (b, j, n)),
        compiler_params=pltpu.CompilerParams(
            dimension_semantics=("parallel", "parallel", "parallel")),
    )(x_unf, w, b2, pos_emb.astype(jnp.float32))


def pallas_ln_linear(x, gamma, beta, w, bias, *, out_dtype=jnp.float32, eps=1e-5):
    """Fused LayerNorm (over last dim) + matmul + bias.

    x (M, K) f32, w (K, N) bf16.  LN in f32, MXU operands bf16, f32 accumulate.
    K (= model width) is small enough to keep un-tiled, so LN sees full rows.
    """
    m, k = x.shape
    n = w.shape[1]
    tm = _pick_tile(m, 256, 8)
    tn = _pick_tile(n, 512, 128)
    g2 = gamma.reshape(1, k).astype(jnp.float32)
    be2 = beta.reshape(1, k).astype(jnp.float32)
    b2 = bias.reshape(1, n).astype(jnp.float32)

    def kernel(x_ref, g_ref, be_ref, w_ref, b_ref, o_ref):
        xv = x_ref[...].astype(jnp.float32)
        mu = jnp.mean(xv, axis=-1, keepdims=True)
        var = jnp.mean(jnp.square(xv - mu), axis=-1, keepdims=True)
        xn = (xv - mu) * jax.lax.rsqrt(var + eps) * g_ref[...] + be_ref[...]
        y = jnp.dot(xn.astype(jnp.bfloat16), w_ref[...],
                    preferred_element_type=jnp.float32) + b_ref[...]
        o_ref[...] = y.astype(out_dtype)

    return pl.pallas_call(
        kernel,
        out_shape=jax.ShapeDtypeStruct((m, n), out_dtype),
        grid=(m // tm, n // tn),
        in_specs=[
            pl.BlockSpec((tm, k), lambda i, j: (i, 0)),
            pl.BlockSpec((1, k), lambda i, j: (0, 0)),
            pl.BlockSpec((1, k), lambda i, j: (0, 0)),
            pl.BlockSpec((k, tn), lambda i, j: (0, j)),
            pl.BlockSpec((1, tn), lambda i, j: (0, j)),
        ],
        out_specs=pl.BlockSpec((tm, tn), lambda i, j: (i, j)),
        compiler_params=pltpu.CompilerParams(
            dimension_semantics=("parallel", "parallel")),
    )(x, g2, be2, w, b2)


def pallas_attn_block(qkv, wo, bo, resid, heads):
    """Fused multi-head attention + output projection + residual add.

    All heads of one (batch*view) are handled in a single grid step; q/k/v are
    sliced out of the packed (1, S, 3*width) bf16 block in-kernel, per-head
    attention outputs land in a VMEM scratch, then a single (S,W)@(W,W) MXU
    matmul applies Wo and the pre-attention residual is added before the only
    HBM store of the block.  No attention intermediate ever hits HBM.
    TODO(synk): for long sequences convert to a flash-style KV-tiled kernel.
    """
    bv, s, threew = qkv.shape
    width = threew // 3
    dh = width // heads
    scale = 1.0 / math.sqrt(dh)
    bo2 = bo.reshape(1, width).astype(jnp.float32)

    def kernel(qkv_ref, wo_ref, bo_ref, r_ref, o_ref, attn_scr):
        qkv_b = qkv_ref[0]                                      # (S, 3*width) bf16
        for hh in range(heads):
            lo = hh * dh
            q = qkv_b[:, lo:lo + dh]
            kk = qkv_b[:, width + lo:width + lo + dh]
            vv = qkv_b[:, 2 * width + lo:2 * width + lo + dh]
            sc = jax.lax.dot_general(q, kk, (((1,), (1,)), ((), ())),
                                     preferred_element_type=jnp.float32) * scale
            mx = jnp.max(sc, axis=-1, keepdims=True)
            p = jnp.exp(sc - mx)
            denom = jnp.sum(p, axis=-1, keepdims=True)
            p = p * pl.reciprocal(denom, approx=True)
            out = jnp.dot(p.astype(jnp.bfloat16), vv,
                          preferred_element_type=jnp.float32)
            attn_scr[:, lo:lo + dh] = out.astype(jnp.bfloat16)
        y = jnp.dot(attn_scr[...], wo_ref[...], preferred_element_type=jnp.float32)
        o_ref[0] = y + bo_ref[...] + r_ref[0].astype(jnp.float32)

    return pl.pallas_call(
        kernel,
        out_shape=jax.ShapeDtypeStruct((bv, s, width), jnp.float32),
        grid=(bv,),
        in_specs=[
            pl.BlockSpec((1, s, threew), lambda i: (i, 0, 0)),
            pl.BlockSpec((width, width), lambda i: (0, 0)),
            pl.BlockSpec((1, width), lambda i: (0, 0)),
            pl.BlockSpec((1, s, width), lambda i: (i, 0, 0)),
        ],
        out_specs=pl.BlockSpec((1, s, width), lambda i: (i, 0, 0)),
        scratch_shapes=[pltpu.VMEM((s, width), jnp.bfloat16)],
        compiler_params=pltpu.CompilerParams(dimension_semantics=("parallel",)),
    )(qkv, wo, bo2, resid)


def pallas_mlp_block(x, gamma, beta, w1, b1, w2, b2, *, eps=1e-5):
    """Fully fused MLP block: out = x + W2 @ GELU(LN(x) @ W1 + b1) + b2.

    The 4*width-wide intermediate stays in VMEM: the hidden dimension is a grid
    reduction axis with an f32 VMEM accumulator (pl.when init / finalize).  The
    LN'd activations are computed once per row tile (kk==0) and cached in a bf16
    VMEM scratch for all hidden tiles.
    """
    m, k = x.shape
    hdim = w1.shape[1]
    tm = _pick_tile(m, 256, 8)
    th = _pick_tile(hdim, 512, 128)
    nh = hdim // th
    g2 = gamma.reshape(1, k).astype(jnp.float32)
    be2 = beta.reshape(1, k).astype(jnp.float32)
    b1r = b1.reshape(1, hdim).astype(jnp.float32)
    b2r = b2.reshape(1, k).astype(jnp.float32)

    def kernel(x_ref, g_ref, be_ref, w1_ref, b1_ref, w2_ref, b2_ref, o_ref,
               acc_ref, xn_ref):
        kk = pl.program_id(1)

        @pl.when(kk == 0)
        def _():
            xv = x_ref[...].astype(jnp.float32)
            mu = jnp.mean(xv, axis=-1, keepdims=True)
            var = jnp.mean(jnp.square(xv - mu), axis=-1, keepdims=True)
            xn = (xv - mu) * jax.lax.rsqrt(var + eps) * g_ref[...] + be_ref[...]
            xn_ref[...] = xn.astype(jnp.bfloat16)
            acc_ref[...] = jnp.zeros_like(acc_ref)

        h = jnp.dot(xn_ref[...], w1_ref[...],
                    preferred_element_type=jnp.float32) + b1_ref[...]
        # TODO(synk): PyTorch nn.GELU defaults to exact erf; tanh approx used here.
        h = jax.nn.gelu(h)
        acc_ref[...] += jnp.dot(h.astype(jnp.bfloat16), w2_ref[...],
                                preferred_element_type=jnp.float32)

        @pl.when(kk == nh - 1)
        def _():
            o_ref[...] = acc_ref[...] + b2_ref[...] + x_ref[...].astype(jnp.float32)

    return pl.pallas_call(
        kernel,
        out_shape=jax.ShapeDtypeStruct((m, k), jnp.float32),
        grid=(m // tm, nh),
        in_specs=[
            pl.BlockSpec((tm, k), lambda i, kk: (i, 0)),
            pl.BlockSpec((1, k), lambda i, kk: (0, 0)),
            pl.BlockSpec((1, k), lambda i, kk: (0, 0)),
            pl.BlockSpec((k, th), lambda i, kk: (0, kk)),
            pl.BlockSpec((1, th), lambda i, kk: (0, kk)),
            pl.BlockSpec((th, k), lambda i, kk: (kk, 0)),
            pl.BlockSpec((1, k), lambda i, kk: (0, 0)),
        ],
        out_specs=pl.BlockSpec((tm, k), lambda i, kk: (i, 0)),
        scratch_shapes=[pltpu.VMEM((tm, k), jnp.float32),
                        pltpu.VMEM((tm, k), jnp.bfloat16)],
        compiler_params=pltpu.CompilerParams(
            dimension_semantics=("parallel", "arbitrary")),
    )(x, g2, be2, w1, b1r, w2, b2r)


def pallas_linear(x, w, bias, *, out_dtype=jnp.float32):
    """Tiled (M,K)@(K,N)+bias with a f32 VMEM accumulator over the K grid axis."""
    m, k = x.shape
    n = w.shape[1]
    tm = _pick_tile(m, 256, 8)
    tn = _pick_tile(n, 256, 128)
    tk = _pick_tile(k, 512, 128)
    nk = k // tk
    b2 = bias.reshape(1, n).astype(jnp.float32)

    def kernel(x_ref, w_ref, b_ref, o_ref, acc_ref):
        kk = pl.program_id(2)

        @pl.when(kk == 0)
        def _():
            acc_ref[...] = jnp.zeros_like(acc_ref)

        acc_ref[...] += jnp.dot(x_ref[...].astype(jnp.bfloat16), w_ref[...],
                                preferred_element_type=jnp.float32)

        @pl.when(kk == nk - 1)
        def _():
            o_ref[...] = (acc_ref[...] + b_ref[...]).astype(out_dtype)

    return pl.pallas_call(
        kernel,
        out_shape=jax.ShapeDtypeStruct((m, n), out_dtype),
        grid=(m // tm, n // tn, nk),
        in_specs=[
            pl.BlockSpec((tm, tk), lambda i, j, kk: (i, kk)),
            pl.BlockSpec((tk, tn), lambda i, j, kk: (kk, j)),
            pl.BlockSpec((1, tn), lambda i, j, kk: (0, j)),
        ],
        out_specs=pl.BlockSpec((tm, tn), lambda i, j, kk: (i, j)),
        scratch_shapes=[pltpu.VMEM((tm, tn), jnp.float32)],
        compiler_params=pltpu.CompilerParams(
            dimension_semantics=("parallel", "parallel", "arbitrary")),
    )(x, w, b2)


def pallas_layernorm(x, gamma, beta, eps=1e-5):
    """Row-parallel tiled LayerNorm (used only for the final norm; others fused)."""
    m, d = x.shape
    tm = _pick_tile(m, 512, 8)
    g2 = gamma.reshape(1, d).astype(jnp.float32)
    b2 = beta.reshape(1, d).astype(jnp.float32)

    def kernel(x_ref, g_ref, b_ref, o_ref):
        xv = x_ref[...].astype(jnp.float32)
        mu = jnp.mean(xv, axis=-1, keepdims=True)
        var = jnp.mean(jnp.square(xv - mu), axis=-1, keepdims=True)
        o_ref[...] = (xv - mu) * jax.lax.rsqrt(var + eps) * g_ref[...] + b_ref[...]

    return pl.pallas_call(
        kernel,
        out_shape=jax.ShapeDtypeStruct((m, d), jnp.float32),
        grid=(m // tm,),
        in_specs=[
            pl.BlockSpec((tm, d), lambda i: (i, 0)),
            pl.BlockSpec((1, d), lambda i: (0, 0)),
            pl.BlockSpec((1, d), lambda i: (0, 0)),
        ],
        out_specs=pl.BlockSpec((tm, d), lambda i: (i, 0)),
        compiler_params=pltpu.CompilerParams(dimension_semantics=("parallel",)),
    )(x, g2, b2)


def _ray_dirs(xy_ref, fxy_ref, c2w_ref, i):
    """Shared per-view ray math; returns unit ray_d rows (1,HW) and origin scalars."""
    x = xy_ref[0:1, :]
    y = xy_ref[1:2, :]
    fx = fxy_ref[i, 0]
    fy = fxy_ref[i, 1]
    cx = fxy_ref[i, 2]
    cy = fxy_ref[i, 3]
    # TODO(synk): matches the reference plucker_embedder convention
    # ((x + 0.5 - cx)/fx on the [0,1]-normalized grid).
    xc = (x + 0.5 - cx) / fx
    yc = (y + 0.5 - cy) / fy
    zc = jnp.ones_like(xc)
    d0 = xc * c2w_ref[i, 0] + yc * c2w_ref[i, 1] + zc * c2w_ref[i, 2]
    d1 = xc * c2w_ref[i, 4] + yc * c2w_ref[i, 5] + zc * c2w_ref[i, 6]
    d2 = xc * c2w_ref[i, 8] + yc * c2w_ref[i, 9] + zc * c2w_ref[i, 10]
    inv = jax.lax.rsqrt(d0 * d0 + d1 * d1 + d2 * d2)
    d0 = d0 * inv
    d1 = d1 * inv
    d2 = d2 * inv
    o0 = c2w_ref[i, 3]
    o1 = c2w_ref[i, 7]
    o2 = c2w_ref[i, 11]
    return d0, d1, d2, o0, o1, o2


def pallas_rays_plucker(xy, fxfycxcy, c2w_flat):
    """Per-view plucker embedding only (ray_o / ray_d never hit HBM).

    xy:        (2, HW)  normalized pixel grid (x row 0, y row 1), shared by views
    fxfycxcy:  (BV, 4)  intrinsics (SMEM)
    c2w_flat:  (BV, 16) row-major flattened 4x4 camera-to-world (SMEM)
    returns plucker (BV, 6, HW)
    """
    bv = fxfycxcy.shape[0]
    hw = xy.shape[1]

    def kernel(xy_ref, fxy_ref, c2w_ref, plk_ref):
        i = pl.program_id(0)
        d0, d1, d2, o0, o1, o2 = _ray_dirs(xy_ref, fxy_ref, c2w_ref, i)
        # plucker = [cross(ray_o, ray_d), ray_d]; direct row stores (no sublane concat).
        plk_ref[0, 0:1, :] = o1 * d2 - o2 * d1
        plk_ref[0, 1:2, :] = o2 * d0 - o0 * d2
        plk_ref[0, 2:3, :] = o0 * d1 - o1 * d0
        plk_ref[0, 3:4, :] = d0
        plk_ref[0, 4:5, :] = d1
        plk_ref[0, 5:6, :] = d2

    return pl.pallas_call(
        kernel,
        out_shape=jax.ShapeDtypeStruct((bv, 6, hw), jnp.float32),
        grid=(bv,),
        in_specs=[
            pl.BlockSpec((2, hw), lambda i: (0, 0)),
            pl.BlockSpec(memory_space=pltpu.MemorySpace.SMEM),
            pl.BlockSpec(memory_space=pltpu.MemorySpace.SMEM),
        ],
        out_specs=pl.BlockSpec((1, 6, hw), lambda i: (i, 0, 0)),
        compiler_params=pltpu.CompilerParams(dimension_semantics=("parallel",)),
    )(xy.astype(jnp.float32), fxfycxcy.astype(jnp.float32),
      c2w_flat.astype(jnp.float32))


def pallas_rays_unproject(xy, fxfycxcy, c2w_flat, depth):
    """Fused ray generation + unprojection: xyz = ray_o + depth * unit_ray_d.
    Avoids writing ray_o / ray_d / plucker to HBM for the unprojection path."""
    bv = fxfycxcy.shape[0]
    hw = xy.shape[1]

    def kernel(xy_ref, fxy_ref, c2w_ref, d_ref, xyz_ref):
        i = pl.program_id(0)
        d0, d1, d2, o0, o1, o2 = _ray_dirs(xy_ref, fxy_ref, c2w_ref, i)
        dep = d_ref[0, 0:1, :]
        # TODO(synk): reference unproject_depth is not provided; xyz = ray_o + depth * unit_ray_d.
        xyz_ref[0, 0:1, :] = o0 + dep * d0
        xyz_ref[0, 1:2, :] = o1 + dep * d1
        xyz_ref[0, 2:3, :] = o2 + dep * d2

    return pl.pallas_call(
        kernel,
        out_shape=jax.ShapeDtypeStruct((bv, 3, hw), jnp.float32),
        grid=(bv,),
        in_specs=[
            pl.BlockSpec((2, hw), lambda i: (0, 0)),
            pl.BlockSpec(memory_space=pltpu.MemorySpace.SMEM),
            pl.BlockSpec(memory_space=pltpu.MemorySpace.SMEM),
            pl.BlockSpec((1, 1, hw), lambda i: (i, 0, 0)),
        ],
        out_specs=pl.BlockSpec((1, 3, hw), lambda i: (i, 0, 0)),
        compiler_params=pltpu.CompilerParams(dimension_semantics=("parallel",)),
    )(xy.astype(jnp.float32), fxfycxcy.astype(jnp.float32),
      c2w_flat.astype(jnp.float32), depth.astype(jnp.float32))


# ---------------------------------------------------------------------------
# Parameters (deterministic synthetic init; weights stored bf16 for the MXU)
# ---------------------------------------------------------------------------

def init_params(key, *, in_ch_total, patch, width, num_layers, num_patches,
                ratio, depth_std):
    def nrm(k, shape, std, dtype=jnp.bfloat16):
        return (std * jax.random.normal(k, shape, jnp.float32)).astype(dtype)

    keys = iter(jax.random.split(key, 16 + 8 * num_layers))
    p = {}
    p["patch_w"] = nrm(next(keys), (in_ch_total * patch * patch, width), 0.02)
    p["patch_b"] = jnp.zeros((width,), jnp.float32)
    p["pos_emb"] = nrm(next(keys), (num_patches, width), 0.02, jnp.float32)
    p["layers"] = []
    for _ in range(num_layers):
        lyr = {
            "ln1_g": jnp.ones((width,), jnp.float32),
            "ln1_b": jnp.zeros((width,), jnp.float32),
            "wqkv": nrm(next(keys), (width, 3 * width), 0.02),
            "bqkv": jnp.zeros((3 * width,), jnp.float32),
            "wo": nrm(next(keys), (width, width), 0.02),
            "bo": jnp.zeros((width,), jnp.float32),
            "ln2_g": jnp.ones((width,), jnp.float32),
            "ln2_b": jnp.zeros((width,), jnp.float32),
            "w1": nrm(next(keys), (width, 4 * width), 0.02),
            "b1": jnp.zeros((4 * width,), jnp.float32),
            "w2": nrm(next(keys), (4 * width, width), 0.02),
            "b2": jnp.zeros((width,), jnp.float32),
        }
        p["layers"].append(lyr)
    p["lnf_g"] = jnp.ones((width,), jnp.float32)
    p["lnf_b"] = jnp.zeros((width,), jnp.float32)

    rr = ratio
    # init_out_layers(): scaling std 0.02, opacity std 0.02, depth std=depth_std
    w_depth = nrm(next(keys), (width, 1 * rr), depth_std)
    w_feature = nrm(next(keys), (width, 3 * rr), 0.02)
    w_opacity = nrm(next(keys), (width, 1 * rr), 0.02)
    w_scaling = nrm(next(keys), (width, 3 * rr), 0.02)
    w_rotation = nrm(next(keys), (width, 4 * rr), 0.02)
    p["heads_w"] = jnp.concatenate(
        [w_depth, w_feature, w_opacity, w_scaling, w_rotation], axis=1)
    hb = jnp.zeros((12 * rr,), jnp.float32)
    hb = hb.at[4 * rr:5 * rr].set(-2.0)   # fold "output_opacity - 2" into the head bias
    p["heads_b"] = hb
    return p


# ---------------------------------------------------------------------------
# Forward pass
# ---------------------------------------------------------------------------

def _make_xy_grid(h, w):
    yy, xx = jnp.meshgrid(jnp.arange(h, dtype=jnp.float32),
                          jnp.arange(w, dtype=jnp.float32), indexing="ij")
    x = xx.reshape(-1) / (w - 1)
    y = yy.reshape(-1) / (h - 1)
    return jnp.stack([x, y], axis=0)            # (2, h*w)


def _pixel_shuffle_last(t, c, r):
    """Channels-last equivalent of nn.PixelShuffle: (BV,Hl,Wl,c*r*r)->(BV,Hl*r,Wl*r,c)."""
    bv, hl, wl, _ = t.shape
    t = t.reshape(bv, hl, wl, c, r, r)
    t = t.transpose(0, 1, 4, 2, 5, 3)
    return t.reshape(bv, hl * r, wl * r, c)


def vit_gs_encoder_forward(params, x, camera, input_c2ws, input_fxfycxcy,
                           *, patch_size, width, heads):
    b, v, c_in, h, w = x.shape
    bv = b * v
    final_res = h                               # half_res_input=False, decoder_ratio=0

    # --- plucker embedding (Pallas ray kernel, plucker only) -------------------
    c2w_flat = camera[:, :, :16].reshape(bv, 16)
    fxy = camera[:, :, 16:].reshape(bv, 4)
    xy = _make_xy_grid(h, w)
    plucker = pallas_rays_plucker(xy, fxy, c2w_flat)            # (bv, 6, hw)
    plucker_img = plucker.reshape(b, v, 6, h, w)
    x_cat = jnp.concatenate([x.astype(jnp.float32), plucker_img], axis=2)  # (b,v,9,h,w)

    # --- patch embedding (conv pxp stride p as unfold + fused matmul+bias+pos) --
    in_ch = c_in + 6
    p = patch_size
    hp, wp = h // p, w // p
    npatch = hp * wp
    xc = x_cat.reshape(bv, in_ch, hp, p, wp, p)
    xc = xc.transpose(0, 2, 4, 1, 3, 5).reshape(bv, npatch, in_ch * p * p)
    tok = pallas_patch_embed(xc, params["patch_w"], params["patch_b"],
                             params["pos_emb"]).reshape(bv * npatch, width)

    # --- transformer encoder (pre-LN ViT blocks, 3 fused kernels per layer) ------
    # TODO(synk): reference TransformerEncoder is undefined; standard pre-LN block used.
    s = npatch
    for lyr in params["layers"]:
        qkv = pallas_ln_linear(tok, lyr["ln1_g"], lyr["ln1_b"], lyr["wqkv"],
                               lyr["bqkv"], out_dtype=jnp.bfloat16)      # LN1 + QKV
        tok = pallas_attn_block(qkv.reshape(bv, s, 3 * width), lyr["wo"],
                                lyr["bo"], tok.reshape(bv, s, width),
                                heads).reshape(bv * s, width)            # attn + Wo + residual
        tok = pallas_mlp_block(tok, lyr["ln2_g"], lyr["ln2_b"], lyr["w1"],
                               lyr["b1"], lyr["w2"], lyr["b2"])          # LN2 + MLP + residual
    tok = pallas_layernorm(tok, params["lnf_g"], params["lnf_b"])

    features = tok.reshape(b, v, npatch, width)

    # --- output heads: fused 1x1 convs as one matmul, then pixelshuffle ---------
    inter = hp                                   # decoder_ratio = 0
    r = p                                        # pixelshuffle factor = sqrt(ratio)
    rr = r * r
    heads_out = pallas_linear(tok, params["heads_w"], params["heads_b"])   # (bv*np, 12*rr)
    heads_out = heads_out.reshape(bv, inter, inter, 12 * rr)

    d_map = _pixel_shuffle_last(heads_out[..., 0:rr], 1, r)
    f_map = _pixel_shuffle_last(heads_out[..., rr:4 * rr], 3, r)
    o_map = _pixel_shuffle_last(heads_out[..., 4 * rr:5 * rr], 1, r)
    s_map = _pixel_shuffle_last(heads_out[..., 5 * rr:8 * rr], 3, r)
    q_map = _pixel_shuffle_last(heads_out[..., 8 * rr:12 * rr], 4, r)

    def to_gaussian_tokens(t, c):
        return t.reshape(b, v * final_res * final_res, c)

    output_feature = to_gaussian_tokens(f_map, 3)
    output_opacity = to_gaussian_tokens(o_map, 1)          # "-2" folded into head bias
    output_scaling = to_gaussian_tokens(s_map, 3)          # 'sigmoid' branch == identity
    output_rotation = to_gaussian_tokens(q_map, 4)
    output_depth = to_gaussian_tokens(d_map, 1)            # (b, v*R*R, 1)

    # depth offset: || c2w[:, :, :3, 3] ||
    c2w_cam = camera[:, :, :16].reshape(b, v, 4, 4)
    ray_o_cam = c2w_cam[:, :, :3, 3]
    depth_offset = jnp.sqrt(jnp.sum(ray_o_cam * ray_o_cam, axis=-1, keepdims=True))  # (b,v,1)
    output_depth = (output_depth.reshape(b, v, -1) + depth_offset).reshape(b, -1, 1)
    output_depth = output_depth.reshape(b, v, final_res, final_res)

    # --- unprojection (single fused rays+unproject kernel) ----------------------
    c2w_in = input_c2ws.reshape(bv, 16)
    fxy_in = input_fxfycxcy.reshape(bv, 4)
    depth_flat = output_depth.reshape(bv, 1, final_res * final_res)
    xyz = pallas_rays_unproject(xy, fxy_in, c2w_in, depth_flat)            # (bv,3,hw)
    output_xyz = xyz.reshape(b, v, 3, final_res * final_res).transpose(0, 1, 3, 2)
    output_xyz = output_xyz.reshape(b, v * final_res * final_res, 3)

    output = {
        "depth": output_depth,
        "xyz": output_xyz,
        "feature": output_feature,
        "opacity": output_opacity,
        "scaling": output_scaling,
        "rotation": output_rotation,
    }
    return output, features


# ---------------------------------------------------------------------------
# Main
# ---------------------------------------------------------------------------

if __name__ == "__main__":
    key = jax.random.PRNGKey(0)
    b, v = 1, 2
    in_channels = 3
    input_res = 16
    patch_size = 8
    num_layers = 2
    width = 64
    heads = max(1, width // 64)
    ratio = patch_size * patch_size
    num_patches = (input_res // patch_size) ** 2
    in_ch_total = in_channels + 6

    k_param, k_x = jax.random.split(key)
    params = init_params(k_param, in_ch_total=in_ch_total, patch=patch_size,
                         width=width, num_layers=num_layers,
                         num_patches=num_patches, ratio=ratio, depth_std=0.015)

    x = jax.random.normal(k_x, (b, v, in_channels, input_res, input_res), jnp.float32)

    # Cameras: identity rotation, per-view translation, normalized intrinsics.
    trans = jnp.array([[0.1, -0.2, 1.5], [0.3, 0.1, 2.0]], jnp.float32)
    c2ws = []
    for vi in range(v):
        m = jnp.eye(4, dtype=jnp.float32).at[:3, 3].set(trans[vi])
        c2ws.append(m)
    c2ws = jnp.stack(c2ws, axis=0)[None]                            # (b, v, 4, 4)
    fxfycxcy = jnp.broadcast_to(jnp.array([1.0, 1.0, 0.5, 0.5], jnp.float32), (b, v, 4))
    camera = jnp.concatenate([c2ws.reshape(b, v, 16), fxfycxcy], axis=-1)   # (b, v, 20)
    input_c2ws = c2ws
    input_fxfycxcy = fxfycxcy

    fwd = jax.jit(vit_gs_encoder_forward,
                  static_argnames=("patch_size", "width", "heads"))
    output, features = fwd(params, x, camera, input_c2ws, input_fxfycxcy,
                           patch_size=patch_size, width=width, heads=heads)

    jax.block_until_ready((output, features))
    print("KERNEL_OK")
</pallas_src>

<mosaic_0001>
module attributes {stable_mosaic.version = 11 : i64} {
  func.func @kernel(%arg0: i32, %arg1: memref<2x256xf32, #tpu.memory_space<vmem>>, %arg2: memref<2x4xf32, #tpu.memory_space<smem>>, %arg3: memref<2x16xf32, #tpu.memory_space<smem>>, %arg4: memref<1x6x256xf32, #tpu.memory_space<vmem>>) attributes {dimension_semantics = [#tpu.dimension_semantics<parallel>], iteration_bounds = array<i64: 2>, scalar_prefetch = 0 : i64, scratch_operands = 0 : i64, tpu.core_type = #tpu.core_type<tc>, window_params = [{pipeline_mode = #tpu.pipeline_mode<synchronous>, transform_indices = @transform_0, window_bounds = array<i64: 2, 256>}, {transform_indices = @transform_1, window_bounds = array<i64: 2, 4>}, {transform_indices = @transform_2, window_bounds = array<i64: 2, 16>}, {transform_indices = @transform_3, window_bounds = array<i64: 1, 6, 256>}]} {
    %c0 = arith.constant 0 : index
    %c0_0 = arith.constant 0 : index
    %0 = vector.load %arg1[%c0, %c0_0] : memref<2x256xf32, #tpu.memory_space<vmem>>, vector<1x256xf32>
    %c1 = arith.constant 1 : index
    %c0_1 = arith.constant 0 : index
    %1 = vector.load %arg1[%c1, %c0_1] : memref<2x256xf32, #tpu.memory_space<vmem>>, vector<1x256xf32>
    %2 = arith.index_cast %arg0 : i32 to index
    %c0_2 = arith.constant 0 : index
    %3 = memref.load %arg2[%2, %c0_2] : memref<2x4xf32, #tpu.memory_space<smem>>
    %4 = arith.index_cast %arg0 : i32 to index
    %c1_3 = arith.constant 1 : index
    %5 = memref.load %arg2[%4, %c1_3] : memref<2x4xf32, #tpu.memory_space<smem>>
    %6 = arith.index_cast %arg0 : i32 to index
    %c2 = arith.constant 2 : index
    %7 = memref.load %arg2[%6, %c2] : memref<2x4xf32, #tpu.memory_space<smem>>
    %8 = arith.index_cast %arg0 : i32 to index
    %c3 = arith.constant 3 : index
    %9 = memref.load %arg2[%8, %c3] : memref<2x4xf32, #tpu.memory_space<smem>>
    %cst = arith.constant 5.000000e-01 : f32
    %10 = vector.broadcast %cst : f32 to vector<1x256xf32>
    %11 = arith.addf %0, %10 : vector<1x256xf32>
    %12 = vector.broadcast %7 : f32 to vector<1x256xf32>
    %13 = arith.subf %11, %12 : vector<1x256xf32>
    %14 = vector.broadcast %3 : f32 to vector<1x256xf32>
    %15 = arith.divf %13, %14 : vector<1x256xf32>
    %cst_4 = arith.constant 5.000000e-01 : f32
    %16 = vector.broadcast %cst_4 : f32 to vector<1x256xf32>
    %17 = arith.addf %1, %16 : vector<1x256xf32>
    %18 = vector.broadcast %9 : f32 to vector<1x256xf32>
    %19 = arith.subf %17, %18 : vector<1x256xf32>
    %20 = vector.broadcast %5 : f32 to vector<1x256xf32>
    %21 = arith.divf %19, %20 : vector<1x256xf32>
    %cst_5 = arith.constant 1.000000e+00 : f32
    %22 = vector.broadcast %cst_5 : f32 to vector<1x256xf32>
    %23 = arith.index_cast %arg0 : i32 to index
    %c0_6 = arith.constant 0 : index
    %24 = memref.load %arg3[%23, %c0_6] : memref<2x16xf32, #tpu.memory_space<smem>>
    %25 = vector.broadcast %24 : f32 to vector<1x256xf32>
    %26 = arith.mulf %15, %25 : vector<1x256xf32>
    %27 = arith.index_cast %arg0 : i32 to index
    %c1_7 = arith.constant 1 : index
    %28 = memref.load %arg3[%27, %c1_7] : memref<2x16xf32, #tpu.memory_space<smem>>
    %29 = vector.broadcast %28 : f32 to vector<1x256xf32>
    %30 = arith.mulf %21, %29 : vector<1x256xf32>
    %31 = arith.addf %26, %30 : vector<1x256xf32>
    %32 = arith.index_cast %arg0 : i32 to index
    %c2_8 = arith.constant 2 : index
    %33 = memref.load %arg3[%32, %c2_8] : memref<2x16xf32, #tpu.memory_space<smem>>
    %34 = vector.broadcast %33 : f32 to vector<1x256xf32>
    %35 = arith.mulf %22, %34 : vector<1x256xf32>
    %36 = arith.addf %31, %35 : vector<1x256xf32>
    %37 = arith.index_cast %arg0 : i32 to index
    %c4 = arith.constant 4 : index
    %38 = memref.load %arg3[%37, %c4] : memref<2x16xf32, #tpu.memory_space<smem>>
    %39 = vector.broadcast %38 : f32 to vector<1x256xf32>
    %40 = arith.mulf %15, %39 : vector<1x256xf32>
    %41 = arith.index_cast %arg0 : i32 to index
    %c5 = arith.constant 5 : index
    %42 = memref.load %arg3[%41, %c5] : memref<2x16xf32, #tpu.memory_space<smem>>
    %43 = vector.broadcast %42 : f32 to vector<1x256xf32>
    %44 = arith.mulf %21, %43 : vector<1x256xf32>
    %45 = arith.addf %40, %44 : vector<1x256xf32>
    %46 = arith.index_cast %arg0 : i32 to index
    %c6 = arith.constant 6 : index
    %47 = memref.load %arg3[%46, %c6] : memref<2x16xf32, #tpu.memory_space<smem>>
    %48 = vector.broadcast %47 : f32 to vector<1x256xf32>
    %49 = arith.mulf %22, %48 : vector<1x256xf32>
    %50 = arith.addf %45, %49 : vector<1x256xf32>
    %51 = arith.index_cast %arg0 : i32 to index
    %c8 = arith.constant 8 : index
    %52 = memref.load %arg3[%51, %c8] : memref<2x16xf32, #tpu.memory_space<smem>>
    %53 = vector.broadcast %52 : f32 to vector<1x256xf32>
    %54 = arith.mulf %15, %53 : vector<1x256xf32>
    %55 = arith.index_cast %arg0 : i32 to index
    %c9 = arith.constant 9 : index
    %56 = memref.load %arg3[%55, %c9] : memref<2x16xf32, #tpu.memory_space<smem>>
    %57 = vector.broadcast %56 : f32 to vector<1x256xf32>
    %58 = arith.mulf %21, %57 : vector<1x256xf32>
    %59 = arith.addf %54, %58 : vector<1x256xf32>
    %60 = arith.index_cast %arg0 : i32 to index
    %c10 = arith.constant 10 : index
    %61 = memref.load %arg3[%60, %c10] : memref<2x16xf32, #tpu.memory_space<smem>>
    %62 = vector.broadcast %61 : f32 to vector<1x256xf32>
    %63 = arith.mulf %22, %62 : vector<1x256xf32>
    %64 = arith.addf %59, %63 : vector<1x256xf32>
    %65 = arith.mulf %36, %36 : vector<1x256xf32>
    %66 = arith.mulf %50, %50 : vector<1x256xf32>
    %67 = arith.addf %65, %66 : vector<1x256xf32>
    %68 = arith.mulf %64, %64 : vector<1x256xf32>
    %69 = arith.addf %67, %68 : vector<1x256xf32>
    %70 = math.rsqrt %69 : vector<1x256xf32>
    %71 = arith.mulf %36, %70 : vector<1x256xf32>
    %72 = arith.mulf %50, %70 : vector<1x256xf32>
    %73 = arith.mulf %64, %70 : vector<1x256xf32>
    %74 = arith.index_cast %arg0 : i32 to index
    %c3_9 = arith.constant 3 : index
    %75 = memref.load %arg3[%74, %c3_9] : memref<2x16xf32, #tpu.memory_space<smem>>
    %76 = arith.index_cast %arg0 : i32 to index
    %c7 = arith.constant 7 : index
    %77 = memref.load %arg3[%76, %c7] : memref<2x16xf32, #tpu.memory_space<smem>>
    %78 = arith.index_cast %arg0 : i32 to index
    %c11 = arith.constant 11 : index
    %79 = memref.load %arg3[%78, %c11] : memref<2x16xf32, #tpu.memory_space<smem>>
    %80 = vector.broadcast %77 : f32 to vector<1x256xf32>
    %81 = arith.mulf %80, %73 : vector<1x256xf32>
    %82 = vector.broadcast %79 : f32 to vector<1x256xf32>
    %83 = arith.mulf %82, %72 : vector<1x256xf32>
    %84 = arith.subf %81, %83 : vector<1x256xf32>
    %c0_10 = arith.constant 0 : index
    %c0_11 = arith.constant 0 : index
    %c0_12 = arith.constant 0 : index
    %85 = vector.load %arg4[%c0_10, %c0_11, %c0_12] : memref<1x6x256xf32, #tpu.memory_space<vmem>>, vector<1x1x256xf32>
    %86 = vector.shape_cast %85 : vector<1x1x256xf32> to vector<1x256xf32>
    %87 = vector.shape_cast %84 : vector<1x256xf32> to vector<1x1x256xf32>
    tpu.vector_store %arg4[%c0_10, %c0_11, %c0_12], %87 {strides = array<i32>} : memref<1x6x256xf32, #tpu.memory_space<vmem>>, vector<1x1x256xf32>,
    %88 = vector.broadcast %79 : f32 to vector<1x256xf32>
    %89 = arith.mulf %88, %71 : vector<1x256xf32>
    %90 = vector.broadcast %75 : f32 to vector<1x256xf32>
    %91 = arith.mulf %90, %73 : vector<1x256xf32>
    %92 = arith.subf %89, %91 : vector<1x256xf32>
    %c0_13 = arith.constant 0 : index
    %c1_14 = arith.constant 1 : index
    %c0_15 = arith.constant 0 : index
    %93 = vector.load %arg4[%c0_13, %c1_14, %c0_15] : memref<1x6x256xf32, #tpu.memory_space<vmem>>, vector<1x1x256xf32>
    %94 = vector.shape_cast %93 : vector<1x1x256xf32> to vector<1x256xf32>
    %95 = vector.shape_cast %92 : vector<1x256xf32> to vector<1x1x256xf32>
    tpu.vector_store %arg4[%c0_13, %c1_14, %c0_15], %95 {strides = array<i32>} : memref<1x6x256xf32, #tpu.memory_space<vmem>>, vector<1x1x256xf32>,
    %96 = vector.broadcast %75 : f32 to vector<1x256xf32>
    %97 = arith.mulf %96, %72 : vector<1x256xf32>
    %98 = vector.broadcast %77 : f32 to vector<1x256xf32>
    %99 = arith.mulf %98, %71 : vector<1x256xf32>
    %100 = arith.subf %97, %99 : vector<1x256xf32>
    %c0_16 = arith.constant 0 : index
    %c2_17 = arith.constant 2 : index
    %c0_18 = arith.constant 0 : index
    %101 = vector.load %arg4[%c0_16, %c2_17, %c0_18] : memref<1x6x256xf32, #tpu.memory_space<vmem>>, vector<1x1x256xf32>
    %102 = vector.shape_cast %101 : vector<1x1x256xf32> to vector<1x256xf32>
    %103 = vector.shape_cast %100 : vector<1x256xf32> to vector<1x1x256xf32>
    tpu.vector_store %arg4[%c0_16, %c2_17, %c0_18], %103 {strides = array<i32>} : memref<1x6x256xf32, #tpu.memory_space<vmem>>, vector<1x1x256xf32>,
    %c0_19 = arith.constant 0 : index
    %c3_20 = arith.constant 3 : index
    %c0_21 = arith.constant 0 : index
    %104 = vector.load %arg4[%c0_19, %c3_20, %c0_21] : memref<1x6x256xf32, #tpu.memory_space<vmem>>, vector<1x1x256xf32>
    %105 = vector.shape_cast %104 : vector<1x1x256xf32> to vector<1x256xf32>
    %106 = vector.shape_cast %71 : vector<1x256xf32> to vector<1x1x256xf32>
    tpu.vector_store %arg4[%c0_19, %c3_20, %c0_21], %106 {strides = array<i32>} : memref<1x6x256xf32, #tpu.memory_space<vmem>>, vector<1x1x256xf32>,
    %c0_22 = arith.constant 0 : index
    %c4_23 = arith.constant 4 : index
    %c0_24 = arith.constant 0 : index
    %107 = vector.load %arg4[%c0_22, %c4_23, %c0_24] : memref<1x6x256xf32, #tpu.memory_space<vmem>>, vector<1x1x256xf32>
    %108 = vector.shape_cast %107 : vector<1x1x256xf32> to vector<1x256xf32>
    %109 = vector.shape_cast %72 : vector<1x256xf32> to vector<1x1x256xf32>
    tpu.vector_store %arg4[%c0_22, %c4_23, %c0_24], %109 {strides = array<i32>} : memref<1x6x256xf32, #tpu.memory_space<vmem>>, vector<1x1x256xf32>,
    %c0_25 = arith.constant 0 : index
    %c5_26 = arith.constant 5 : index
    %c0_27 = arith.constant 0 : index
    %110 = vector.load %arg4[%c0_25, %c5_26, %c0_27] : memref<1x6x256xf32, #tpu.memory_space<vmem>>, vector<1x1x256xf32>
    %111 = vector.shape_cast %110 : vector<1x1x256xf32> to vector<1x256xf32>
    %112 = vector.shape_cast %73 : vector<1x256xf32> to vector<1x1x256xf32>
    tpu.vector_store %arg4[%c0_25, %c5_26, %c0_27], %112 {strides = array<i32>} : memref<1x6x256xf32, #tpu.memory_space<vmem>>, vector<1x1x256xf32>,
    return
  }
  func.func @transform_0(%arg0: i32) -> (i32, i32) {
    %c0_i32 = arith.constant 0 : i32
    %c0_i32_0 = arith.constant 0 : i32
    %c0_i32_1 = arith.constant 0 : i32
    return %c0_i32, %c0_i32_0 : i32, i32
  }
  func.func @transform_1(%arg0: i32) -> (i32, i32) {
    %c0_i32 = arith.constant 0 : i32
    %c0_i32_0 = arith.constant 0 : i32
    %c0_i32_1 = arith.constant 0 : i32
    return %c0_i32, %c0_i32_0 : i32, i32
  }
  func.func @transform_2(%arg0: i32) -> (i32, i32) {
    %c0_i32 = arith.constant 0 : i32
    %c0_i32_0 = arith.constant 0 : i32
    %c0_i32_1 = arith.constant 0 : i32
    return %c0_i32, %c0_i32_0 : i32, i32
  }
  func.func @transform_3(%arg0: i32) -> (i32, i32, i32) {
    %c0_i32 = arith.constant 0 : i32
    %c0_i32_0 = arith.constant 0 : i32
    %c0_i32_1 = arith.constant 0 : i32
    return %arg0, %c0_i32, %c0_i32_0 : i32, i32, i32
  }
}

module attributes {stable_mosaic.version = 11 : i64} {
  func.func @kernel(%arg0: i32, %arg1: i32, %arg2: i32, %arg3: memref<1x4x576xf32, #tpu.memory_space<vmem>>, %arg4: memref<576x64xbf16, #tpu.memory_space<vmem>>, %arg5: memref<1x64xf32, #tpu.memory_space<vmem>>, %arg6: memref<4x64xf32, #tpu.memory_space<vmem>>, %arg7: memref<1x4x64xf32, #tpu.memory_space<vmem>>) attributes {dimension_semantics = [#tpu.dimension_semantics<parallel>, #tpu.dimension_semantics<parallel>, #tpu.dimension_semantics<parallel>], iteration_bounds = array<i64: 2, 1, 1>, scalar_prefetch = 0 : i64, scratch_operands = 0 : i64, tpu.core_type = #tpu.core_type<tc>, window_params = [{transform_indices = @transform_0, window_bounds = array<i64: 1, 4, 576>}, {transform_indices = @transform_1, window_bounds = array<i64: 576, 64>}, {transform_indices = @transform_2, window_bounds = array<i64: 1, 64>}, {transform_indices = @transform_3, window_bounds = array<i64: 4, 64>}, {transform_indices = @transform_4, window_bounds = array<i64: 1, 4, 64>}]} {
    %c0 = arith.constant 0 : index
    %c0_0 = arith.constant 0 : index
    %c0_1 = arith.constant 0 : index
    %0 = vector.load %arg3[%c0, %c0_0, %c0_1] : memref<1x4x576xf32, #tpu.memory_space<vmem>>, vector<1x4x576xf32>
    %1 = vector.shape_cast %0 : vector<1x4x576xf32> to vector<4x576xf32>
    %2 = arith.truncf %1 : vector<4x576xf32> to vector<4x576xbf16>
    %c0_2 = arith.constant 0 : index
    %c0_3 = arith.constant 0 : index
    %3 = vector.load %arg4[%c0_2, %c0_3] : memref<576x64xbf16, #tpu.memory_space<vmem>>, vector<576x64xbf16>
    %cst = arith.constant dense<0.000000e+00> : vector<4x64xf32>
    %4 = tpu.matmul %2, %3, %cst {dimension_numbers = #tpu.dot_dimension_numbers<[1], [0], [0], [1], [0, 0, 1, 1], [], []>} : vector<4x576xbf16>, vector<576x64xbf16>, vector<4x64xf32> -> vector<4x64xf32>
    %c0_4 = arith.constant 0 : index
    %c0_5 = arith.constant 0 : index
    %5 = vector.load %arg5[%c0_4, %c0_5] : memref<1x64xf32, #tpu.memory_space<vmem>>, vector<1x64xf32>
    %6 = vector.broadcast %5 : vector<1x64xf32> to vector<4x64xf32>
    %7 = arith.addf %4, %6 : vector<4x64xf32>
    %c0_6 = arith.constant 0 : index
    %c0_7 = arith.constant 0 : index
    %8 = vector.load %arg6[%c0_6, %c0_7] : memref<4x64xf32, #tpu.memory_space<vmem>>, vector<4x64xf32>
    %9 = arith.addf %7, %8 : vector<4x64xf32>
    %c0_8 = arith.constant 0 : index
    %c0_9 = arith.constant 0 : index
    %c0_10 = arith.constant 0 : index
    %10 = vector.load %arg7[%c0_8, %c0_9, %c0_10] : memref<1x4x64xf32, #tpu.memory_space<vmem>>, vector<1x4x64xf32>
    %11 = vector.shape_cast %10 : vector<1x4x64xf32> to vector<4x64xf32>
    %12 = vector.shape_cast %9 : vector<4x64xf32> to vector<1x4x64xf32>
    tpu.vector_store %arg7[%c0_8, %c0_9, %c0_10], %12 {strides = array<i32>} : memref<1x4x64xf32, #tpu.memory_space<vmem>>, vector<1x4x64xf32>,
    return
  }
  func.func @transform_0(%arg0: i32, %arg1: i32, %arg2: i32) -> (i32, i32, i32) {
    %c0_i32 = arith.constant 0 : i32
    %c0_i32_0 = arith.constant 0 : i32
    return %arg0, %arg1, %c0_i32 : i32, i32, i32
  }
  func.func @transform_1(%arg0: i32, %arg1: i32, %arg2: i32) -> (i32, i32) {
    %c0_i32 = arith.constant 0 : i32
    %c0_i32_0 = arith.constant 0 : i32
    return %c0_i32, %arg2 : i32, i32
  }
  func.func @transform_2(%arg0: i32, %arg1: i32, %arg2: i32) -> (i32, i32) {
    %c0_i32 = arith.constant 0 : i32
    %c0_i32_0 = arith.constant 0 : i32
    return %c0_i32, %arg2 : i32, i32
  }
  func.func @transform_3(%arg0: i32, %arg1: i32, %arg2: i32) -> (i32, i32) {
    %c0_i32 = arith.constant 0 : i32
    return %arg1, %arg2 : i32, i32
  }
  func.func @transform_4(%arg0: i32, %arg1: i32, %arg2: i32) -> (i32, i32, i32) {
    %c0_i32 = arith.constant 0 : i32
    return %arg0, %arg1, %arg2 : i32, i32, i32
  }
}

module attributes {stable_mosaic.version = 11 : i64} {
  func.func @kernel(%arg0: i32, %arg1: i32, %arg2: memref<8x64xf32, #tpu.memory_space<vmem>>, %arg3: memref<1x64xf32, #tpu.memory_space<vmem>>, %arg4: memref<1x64xf32, #tpu.memory_space<vmem>>, %arg5: memref<64x192xbf16, #tpu.memory_space<vmem>>, %arg6: memref<1x192xf32, #tpu.memory_space<vmem>>, %arg7: memref<8x192xbf16, #tpu.memory_space<vmem>>) attributes {dimension_semantics = [#tpu.dimension_semantics<parallel>, #tpu.dimension_semantics<parallel>], iteration_bounds = array<i64: 1, 1>, scalar_prefetch = 0 : i64, scratch_operands = 0 : i64, tpu.core_type = #tpu.core_type<tc>, window_params = [{transform_indices = @transform_0, window_bounds = array<i64: 8, 64>}, {pipeline_mode = #tpu.pipeline_mode<synchronous>, transform_indices = @transform_1, window_bounds = array<i64: 1, 64>}, {pipeline_mode = #tpu.pipeline_mode<synchronous>, transform_indices = @transform_2, window_bounds = array<i64: 1, 64>}, {transform_indices = @transform_3, window_bounds = array<i64: 64, 192>}, {transform_indices = @transform_4, window_bounds = array<i64: 1, 192>}, {transform_indices = @transform_5, window_bounds = array<i64: 8, 192>}]} {
    %c0 = arith.constant 0 : index
    %c0_0 = arith.constant 0 : index
    %0 = vector.load %arg2[%c0, %c0_0] : memref<8x64xf32, #tpu.memory_space<vmem>>, vector<8x64xf32>
    %cst = arith.constant dense<0.000000e+00> : vector<8xf32>
    %1 = vector.multi_reduction <add>, %0, %cst [1] : vector<8x64xf32> to vector<8xf32>
    %2 = vector.shape_cast %1 : vector<8xf32> to vector<8x1xf32>
    %cst_1 = arith.constant 6.400000e+01 : f32
    %3 = vector.broadcast %cst_1 : f32 to vector<8x1xf32>
    %4 = arith.divf %2, %3 : vector<8x1xf32>
    %5 = vector.broadcast %4 : vector<8x1xf32> to vector<8x64xf32>
    %6 = arith.subf %0, %5 : vector<8x64xf32>
    %7 = arith.mulf %6, %6 : vector<8x64xf32>
    %cst_2 = arith.constant dense<0.000000e+00> : vector<8xf32>
    %8 = vector.multi_reduction <add>, %7, %cst_2 [1] : vector<8x64xf32> to vector<8xf32>
    %9 = vector.shape_cast %8 : vector<8xf32> to vector<8x1xf32>
    %cst_3 = arith.constant 6.400000e+01 : f32
    %10 = vector.broadcast %cst_3 : f32 to vector<8x1xf32>
    %11 = arith.divf %9, %10 : vector<8x1xf32>
    %12 = vector.broadcast %4 : vector<8x1xf32> to vector<8x64xf32>
    %13 = arith.subf %0, %12 : vector<8x64xf32>
    %cst_4 = arith.constant 9.99999974E-6 : f32
    %14 = vector.broadcast %cst_4 : f32 to vector<8x1xf32>
    %15 = arith.addf %11, %14 : vector<8x1xf32>
    %16 = math.rsqrt %15 : vector<8x1xf32>
    %17 = vector.broadcast %16 : vector<8x1xf32> to vector<8x64xf32>
    %18 = arith.mulf %13, %17 : vector<8x64xf32>
    %c0_5 = arith.constant 0 : index
    %c0_6 = arith.constant 0 : index
    %19 = vector.load %arg3[%c0_5, %c0_6] : memref<1x64xf32, #tpu.memory_space<vmem>>, vector<1x64xf32>
    %20 = vector.broadcast %19 : vector<1x64xf32> to vector<8x64xf32>
    %21 = arith.mulf %18, %20 : vector<8x64xf32>
    %c0_7 = arith.constant 0 : index
    %c0_8 = arith.constant 0 : index
    %22 = vector.load %arg4[%c0_7, %c0_8] : memref<1x64xf32, #tpu.memory_space<vmem>>, vector<1x64xf32>
    %23 = vector.broadcast %22 : vector<1x64xf32> to vector<8x64xf32>
    %24 = arith.addf %21, %23 : vector<8x64xf32>
    %25 = arith.truncf %24 : vector<8x64xf32> to vector<8x64xbf16>
    %c0_9 = arith.constant 0 : index
    %c0_10 = arith.constant 0 : index
    %26 = vector.load %arg5[%c0_9, %c0_10] : memref<64x192xbf16, #tpu.memory_space<vmem>>, vector<64x192xbf16>
    %cst_11 = arith.constant dense<0.000000e+00> : vector<8x192xf32>
    %27 = tpu.matmul %25, %26, %cst_11 {dimension_numbers = #tpu.dot_dimension_numbers<[1], [0], [0], [1], [0, 0, 1, 1], [], []>} : vector<8x64xbf16>, vector<64x192xbf16>, vector<8x192xf32> -> vector<8x192xf32>
    %c0_12 = arith.constant 0 : index
    %c0_13 = arith.constant 0 : index
    %28 = vector.load %arg6[%c0_12, %c0_13] : memref<1x192xf32, #tpu.memory_space<vmem>>, vector<1x192xf32>
    %29 = vector.broadcast %28 : vector<1x192xf32> to vector<8x192xf32>
    %30 = arith.addf %27, %29 : vector<8x192xf32>
    %31 = arith.truncf %30 : vector<8x192xf32> to vector<8x192xbf16>
    %c0_14 = arith.constant 0 : index
    %c0_15 = arith.constant 0 : index
    %32 = vector.load %arg7[%c0_14, %c0_15] : memref<8x192xbf16, #tpu.memory_space<vmem>>, vector<8x192xbf16>
    tpu.vector_store %arg7[%c0_14, %c0_15], %31 {strides = array<i32>} : memref<8x192xbf16, #tpu.memory_space<vmem>>, vector<8x192xbf16>,
    return
  }
  func.func @transform_0(%arg0: i32, %arg1: i32) -> (i32, i32) {
    %c0_i32 = arith.constant 0 : i32
    %c0_i32_0 = arith.constant 0 : i32
    return %arg0, %c0_i32 : i32, i32
  }
  func.func @transform_1(%arg0: i32, %arg1: i32) -> (i32, i32) {
    %c0_i32 = arith.constant 0 : i32
    %c0_i32_0 = arith.constant 0 : i32
    %c0_i32_1 = arith.constant 0 : i32
    return %c0_i32, %c0_i32_0 : i32, i32
  }
  func.func @transform_2(%arg0: i32, %arg1: i32) -> (i32, i32) {
    %c0_i32 = arith.constant 0 : i32
    %c0_i32_0 = arith.constant 0 : i32
    %c0_i32_1 = arith.constant 0 : i32
    return %c0_i32, %c0_i32_0 : i32, i32
  }
  func.func @transform_3(%arg0: i32, %arg1: i32) -> (i32, i32) {
    %c0_i32 = arith.constant 0 : i32
    %c0_i32_0 = arith.constant 0 : i32
    return %c0_i32, %arg1 : i32, i32
  }
  func.func @transform_4(%arg0: i32, %arg1: i32) -> (i32, i32) {
    %c0_i32 = arith.constant 0 : i32
    %c0_i32_0 = arith.constant 0 : i32
    return %c0_i32, %arg1 : i32, i32
  }
  func.func @transform_5(%arg0: i32, %arg1: i32) -> (i32, i32) {
    %c0_i32 = arith.constant 0 : i32
    return %arg0, %arg1 : i32, i32
  }
}

module attributes {stable_mosaic.version = 11 : i64} {
  func.func @kernel(%arg0: i32, %arg1: i32, %arg2: memref<8x64xf32, #tpu.memory_space<vmem>>, %arg3: memref<1x64xf32, #tpu.memory_space<vmem>>, %arg4: memref<1x64xf32, #tpu.memory_space<vmem>>, %arg5: memref<64x256xbf16, #tpu.memory_space<vmem>>, %arg6: memref<1x256xf32, #tpu.memory_space<vmem>>, %arg7: memref<256x64xbf16, #tpu.memory_space<vmem>>, %arg8: memref<1x64xf32, #tpu.memory_space<vmem>>, %arg9: memref<8x64xf32, #tpu.memory_space<vmem>>, %arg10: memref<8x64xf32, #tpu.memory_space<vmem>>, %arg11: memref<8x64xbf16, #tpu.memory_space<vmem>>) attributes {dimension_semantics = [#tpu.dimension_semantics<parallel>, #tpu.dimension_semantics<arbitrary>], iteration_bounds = array<i64: 1, 1>, scalar_prefetch = 0 : i64, scratch_operands = 2 : i64, tpu.core_type = #tpu.core_type<tc>, window_params = [{transform_indices = @transform_0, window_bounds = array<i64: 8, 64>}, {pipeline_mode = #tpu.pipeline_mode<synchronous>, transform_indices = @transform_1, window_bounds = array<i64: 1, 64>}, {pipeline_mode = #tpu.pipeline_mode<synchronous>, transform_indices = @transform_2, window_bounds = array<i64: 1, 64>}, {transform_indices = @transform_3, window_bounds = array<i64: 64, 256>}, {transform_indices = @transform_4, window_bounds = array<i64: 1, 256>}, {transform_indices = @transform_5, window_bounds = array<i64: 256, 64>}, {pipeline_mode = #tpu.pipeline_mode<synchronous>, transform_indices = @transform_6, window_bounds = array<i64: 1, 64>}, {transform_indices = @transform_7, window_bounds = array<i64: 8, 64>}]} {
    %c0_i32 = arith.constant 0 : i32
    %0 = arith.cmpi eq, %arg1, %c0_i32 : i32
    %1 = arith.extui %0 : i1 to i32
    %c0_i32_0 = arith.constant 0 : i32
    %2 = arith.cmpi ne, %1, %c0_i32_0 : i32
    scf.if %2 {
      %c0_19 = arith.constant 0 : index
      %c0_20 = arith.constant 0 : index
      %31 = vector.load %arg2[%c0_19, %c0_20] : memref<8x64xf32, #tpu.memory_space<vmem>>, vector<8x64xf32>
      %cst_21 = arith.constant dense<0.000000e+00> : vector<8xf32>
      %32 = vector.multi_reduction <add>, %31, %cst_21 [1] : vector<8x64xf32> to vector<8xf32>
      %33 = vector.shape_cast %32 : vector<8xf32> to vector<8x1xf32>
      %cst_22 = arith.constant 6.400000e+01 : f32
      %34 = vector.broadcast %cst_22 : f32 to vector<8x1xf32>
      %35 = arith.divf %33, %34 : vector<8x1xf32>
      %36 = vector.broadcast %35 : vector<8x1xf32> to vector<8x64xf32>
      %37 = arith.subf %31, %36 : vector<8x64xf32>
      %38 = arith.mulf %37, %37 : vector<8x64xf32>
      %cst_23 = arith.constant dense<0.000000e+00> : vector<8xf32>
      %39 = vector.multi_reduction <add>, %38, %cst_23 [1] : vector<8x64xf32> to vector<8xf32>
      %40 = vector.shape_cast %39 : vector<8xf32> to vector<8x1xf32>
      %cst_24 = arith.constant 6.400000e+01 : f32
      %41 = vector.broadcast %cst_24 : f32 to vector<8x1xf32>
      %42 = arith.divf %40, %41 : vector<8x1xf32>
      %43 = vector.broadcast %35 : vector<8x1xf32> to vector<8x64xf32>
      %44 = arith.subf %31, %43 : vector<8x64xf32>
      %cst_25 = arith.constant 9.99999974E-6 : f32
      %45 = vector.broadcast %cst_25 : f32 to vector<8x1xf32>
      %46 = arith.addf %42, %45 : vector<8x1xf32>
      %47 = math.rsqrt %46 : vector<8x1xf32>
      %48 = vector.broadcast %47 : vector<8x1xf32> to vector<8x64xf32>
      %49 = arith.mulf %44, %48 : vector<8x64xf32>
      %c0_26 = arith.constant 0 : index
      %c0_27 = arith.constant 0 : index
      %50 = vector.load %arg3[%c0_26, %c0_27] : memref<1x64xf32, #tpu.memory_space<vmem>>, vector<1x64xf32>
      %51 = vector.broadcast %50 : vector<1x64xf32> to vector<8x64xf32>
      %52 = arith.mulf %49, %51 : vector<8x64xf32>
      %c0_28 = arith.constant 0 : index
      %c0_29 = arith.constant 0 : index
      %53 = vector.load %arg4[%c0_28, %c0_29] : memref<1x64xf32, #tpu.memory_space<vmem>>, vector<1x64xf32>
      %54 = vector.broadcast %53 : vector<1x64xf32> to vector<8x64xf32>
      %55 = arith.addf %52, %54 : vector<8x64xf32>
      %56 = arith.truncf %55 : vector<8x64xf32> to vector<8x64xbf16>
      %c0_30 = arith.constant 0 : index
      %c0_31 = arith.constant 0 : index
      %57 = vector.load %arg11[%c0_30, %c0_31] : memref<8x64xbf16, #tpu.memory_space<vmem>>, vector<8x64xbf16>
      tpu.vector_store %arg11[%c0_30, %c0_31], %56 {strides = array<i32>} : memref<8x64xbf16, #tpu.memory_space<vmem>>, vector<8x64xbf16>,
      %cst_32 = arith.constant 0.000000e+00 : f32
      %58 = vector.broadcast %cst_32 : f32 to vector<8x64xf32>
      %c0_33 = arith.constant 0 : index
      %c0_34 = arith.constant 0 : index
      %59 = vector.load %arg10[%c0_33, %c0_34] : memref<8x64xf32, #tpu.memory_space<vmem>>, vector<8x64xf32>
      tpu.vector_store %arg10[%c0_33, %c0_34], %58 {strides = array<i32>} : memref<8x64xf32, #tpu.memory_space<vmem>>, vector<8x64xf32>,
    } else {
    }
    %c0 = arith.constant 0 : index
    %c0_1 = arith.constant 0 : index
    %3 = vector.load %arg11[%c0, %c0_1] : memref<8x64xbf16, #tpu.memory_space<vmem>>, vector<8x64xbf16>
    %c0_2 = arith.constant 0 : index
    %c0_3 = arith.constant 0 : index
    %4 = vector.load %arg5[%c0_2, %c0_3] : memref<64x256xbf16, #tpu.memory_space<vmem>>, vector<64x256xbf16>
    %cst = arith.constant dense<0.000000e+00> : vector<8x256xf32>
    %5 = tpu.matmul %3, %4, %cst {dimension_numbers = #tpu.dot_dimension_numbers<[1], [0], [0], [1], [0, 0, 1, 1], [], []>} : vector<8x64xbf16>, vector<64x256xbf16>, vector<8x256xf32> -> vector<8x256xf32>
    %c0_4 = arith.constant 0 : index
    %c0_5 = arith.constant 0 : index
    %6 = vector.load %arg6[%c0_4, %c0_5] : memref<1x256xf32, #tpu.memory_space<vmem>>, vector<1x256xf32>
    %7 = vector.broadcast %6 : vector<1x256xf32> to vector<8x256xf32>
    %8 = arith.addf %5, %7 : vector<8x256xf32>
    %9 = arith.mulf %8, %8 : vector<8x256xf32>
    %10 = arith.mulf %8, %9 : vector<8x256xf32>
    %cst_6 = arith.constant 4.471500e-02 : f32
    %11 = vector.broadcast %cst_6 : f32 to vector<8x256xf32>
    %12 = arith.mulf %11, %10 : vector<8x256xf32>
    %13 = arith.addf %8, %12 : vector<8x256xf32>
    %cst_7 = arith.constant 0.797884583 : f32
    %14 = vector.broadcast %cst_7 : f32 to vector<8x256xf32>
    %15 = arith.mulf %14, %13 : vector<8x256xf32>
    %16 = math.tanh %15 : vector<8x256xf32>
    %cst_8 = arith.constant 1.000000e+00 : f32
    %17 = vector.broadcast %cst_8 : f32 to vector<8x256xf32>
    %18 = arith.addf %17, %16 : vector<8x256xf32>
    %cst_9 = arith.constant 5.000000e-01 : f32
    %19 = vector.broadcast %cst_9 : f32 to vector<8x256xf32>
    %20 = arith.mulf %19, %18 : vector<8x256xf32>
    %21 = arith.mulf %8, %20 : vector<8x256xf32>
    %c0_10 = arith.constant 0 : index
    %c0_11 = arith.constant 0 : index
    %22 = vector.load %arg10[%c0_10, %c0_11] : memref<8x64xf32, #tpu.memory_space<vmem>>, vector<8x64xf32>
    %23 = arith.truncf %21 : vector<8x256xf32> to vector<8x256xbf16>
    %c0_12 = arith.constant 0 : index
    %c0_13 = arith.constant 0 : index
    %24 = vector.load %arg7[%c0_12, %c0_13] : memref<256x64xbf16, #tpu.memory_space<vmem>>, vector<256x64xbf16>
    %cst_14 = arith.constant dense<0.000000e+00> : vector<8x64xf32>
    %25 = tpu.matmul %23, %24, %cst_14 {dimension_numbers = #tpu.dot_dimension_numbers<[1], [0], [0], [1], [0, 0, 1, 1], [], []>} : vector<8x256xbf16>, vector<256x64xbf16>, vector<8x64xf32> -> vector<8x64xf32>
    %26 = arith.addf %22, %25 : vector<8x64xf32>
    %c0_15 = arith.constant 0 : index
    %c0_16 = arith.constant 0 : index
    %27 = vector.load %arg10[%c0_15, %c0_16] : memref<8x64xf32, #tpu.memory_space<vmem>>, vector<8x64xf32>
    tpu.vector_store %arg10[%c0_15, %c0_16], %26 {strides = array<i32>} : memref<8x64xf32, #tpu.memory_space<vmem>>, vector<8x64xf32>,
    %c0_i32_17 = arith.constant 0 : i32
    %28 = arith.cmpi eq, %arg1, %c0_i32_17 : i32
    %29 = arith.extui %28 : i1 to i32
    %c0_i32_18 = arith.constant 0 : i32
    %30 = arith.cmpi ne, %29, %c0_i32_18 : i32
    scf.if %30 {
      %c0_19 = arith.constant 0 : index
      %c0_20 = arith.constant 0 : index
      %31 = vector.load %arg10[%c0_19, %c0_20] : memref<8x64xf32, #tpu.memory_space<vmem>>, vector<8x64xf32>
      %c0_21 = arith.constant 0 : index
      %c0_22 = arith.constant 0 : index
      %32 = vector.load %arg8[%c0_21, %c0_22] : memref<1x64xf32, #tpu.memory_space<vmem>>, vector<1x64xf32>
      %33 = vector.broadcast %32 : vector<1x64xf32> to vector<8x64xf32>
      %34 = arith.addf %31, %33 : vector<8x64xf32>
      %c0_23 = arith.constant 0 : index
      %c0_24 = arith.constant 0 : index
      %35 = vector.load %arg2[%c0_23, %c0_24] : memref<8x64xf32, #tpu.memory_space<vmem>>, vector<8x64xf32>
      %36 = arith.addf %34, %35 : vector<8x64xf32>
      %c0_25 = arith.constant 0 : index
      %c0_26 = arith.constant 0 : index
      %37 = vector.load %arg9[%c0_25, %c0_26] : memref<8x64xf32, #tpu.memory_space<vmem>>, vector<8x64xf32>
      tpu.vector_store %arg9[%c0_25, %c0_26], %36 {strides = array<i32>} : memref<8x64xf32, #tpu.memory_space<vmem>>, vector<8x64xf32>,
    } else {
    }
    return
  }
  func.func @transform_0(%arg0: i32, %arg1: i32) -> (i32, i32) {
    %c0_i32 = arith.constant 0 : i32
    %c0_i32_0 = arith.constant 0 : i32
    return %arg0, %c0_i32 : i32, i32
  }
  func.func @transform_1(%arg0: i32, %arg1: i32) -> (i32, i32) {
    %c0_i32 = arith.constant 0 : i32
    %c0_i32_0 = arith.constant 0 : i32
    %c0_i32_1 = arith.constant 0 : i32
    return %c0_i32, %c0_i32_0 : i32, i32
  }
  func.func @transform_2(%arg0: i32, %arg1: i32) -> (i32, i32) {
    %c0_i32 = arith.constant 0 : i32
    %c0_i32_0 = arith.constant 0 : i32
    %c0_i32_1 = arith.constant 0 : i32
    return %c0_i32, %c0_i32_0 : i32, i32
  }
  func.func @transform_3(%arg0: i32, %arg1: i32) -> (i32, i32) {
    %c0_i32 = arith.constant 0 : i32
    %c0_i32_0 = arith.constant 0 : i32
    return %c0_i32, %arg1 : i32, i32
  }
  func.func @transform_4(%arg0: i32, %arg1: i32) -> (i32, i32) {
    %c0_i32 = arith.constant 0 : i32
    %c0_i32_0 = arith.constant 0 : i32
    return %c0_i32, %arg1 : i32, i32
  }
  func.func @transform_5(%arg0: i32, %arg1: i32) -> (i32, i32) {
    %c0_i32 = arith.constant 0 : i32
    %c0_i32_0 = arith.constant 0 : i32
    return %arg1, %c0_i32 : i32, i32
  }
  func.func @transform_6(%arg0: i32, %arg1: i32) -> (i32, i32) {
    %c0_i32 = arith.constant 0 : i32
    %c0_i32_0 = arith.constant 0 : i32
    %c0_i32_1 = arith.constant 0 : i32
    return %c0_i32, %c0_i32_0 : i32, i32
  }
  func.func @transform_7(%arg0: i32, %arg1: i32) -> (i32, i32) {
    %c0_i32 = arith.constant 0 : i32
    %c0_i32_0 = arith.constant 0 : i32
    return %arg0, %c0_i32 : i32, i32
  }
}

module attributes {stable_mosaic.version = 11 : i64} {
  func.func @kernel(%arg0: i32, %arg1: memref<1x4x192xbf16, #tpu.memory_space<vmem>>, %arg2: memref<64x64xbf16, #tpu.memory_space<vmem>>, %arg3: memref<1x64xf32, #tpu.memory_space<vmem>>, %arg4: memref<1x4x64xf32, #tpu.memory_space<vmem>>, %arg5: memref<1x4x64xf32, #tpu.memory_space<vmem>>, %arg6: memref<4x64xbf16, #tpu.memory_space<vmem>>) attributes {dimension_semantics = [#tpu.dimension_semantics<parallel>], iteration_bounds = array<i64: 2>, scalar_prefetch = 0 : i64, scratch_operands = 1 : i64, tpu.core_type = #tpu.core_type<tc>, window_params = [{transform_indices = @transform_0, window_bounds = array<i64: 1, 4, 192>}, {pipeline_mode = #tpu.pipeline_mode<synchronous>, transform_indices = @transform_1, window_bounds = array<i64: 64, 64>}, {pipeline_mode = #tpu.pipeline_mode<synchronous>, transform_indices = @transform_2, window_bounds = array<i64: 1, 64>}, {transform_indices = @transform_3, window_bounds = array<i64: 1, 4, 64>}, {transform_indices = @transform_4, window_bounds = array<i64: 1, 4, 64>}]} {
    %c0 = arith.constant 0 : index
    %c0_0 = arith.constant 0 : index
    %c0_1 = arith.constant 0 : index
    %0 = vector.load %arg1[%c0, %c0_0, %c0_1] : memref<1x4x192xbf16, #tpu.memory_space<vmem>>, vector<1x4x192xbf16>
    %1 = vector.shape_cast %0 : vector<1x4x192xbf16> to vector<4x192xbf16>
    %2 = vector.extract_strided_slice %1 {offsets = [0, 0], sizes = [4, 64], strides = [1, 1]} : vector<4x192xbf16> to vector<4x64xbf16>
    %3 = vector.extract_strided_slice %1 {offsets = [0, 64], sizes = [4, 64], strides = [1, 1]} : vector<4x192xbf16> to vector<4x64xbf16>
    %4 = vector.extract_strided_slice %1 {offsets = [0, 128], sizes = [4, 64], strides = [1, 1]} : vector<4x192xbf16> to vector<4x64xbf16>
    %cst = arith.constant dense<0.000000e+00> : vector<4x4xf32>
    %5 = tpu.matmul %2, %3, %cst {dimension_numbers = #tpu.dot_dimension_numbers<[1], [1], [0], [0], [0, 0, 1, 0], [], []>} : vector<4x64xbf16>, vector<4x64xbf16>, vector<4x4xf32> -> vector<4x4xf32>
    %cst_2 = arith.constant 1.250000e-01 : f32
    %6 = vector.broadcast %cst_2 : f32 to vector<4x4xf32>
    %7 = arith.mulf %5, %6 : vector<4x4xf32>
    %cst_3 = arith.constant dense<0xFF800000> : vector<4xf32>
    %8 = vector.multi_reduction <maximumf>, %7, %cst_3 [1] : vector<4x4xf32> to vector<4xf32>
    %9 = vector.shape_cast %8 : vector<4xf32> to vector<4x1xf32>
    %10 = vector.broadcast %9 : vector<4x1xf32> to vector<4x4xf32>
    %11 = arith.subf %7, %10 : vector<4x4xf32>
    %12 = math.exp %11 : vector<4x4xf32>
    %cst_4 = arith.constant dense<0.000000e+00> : vector<4xf32>
    %13 = vector.multi_reduction <add>, %12, %cst_4 [1] : vector<4x4xf32> to vector<4xf32>
    %14 = vector.shape_cast %13 : vector<4xf32> to vector<4x1xf32>
    %15 = tpu.reciprocal %14 {approx = true} : vector<4x1xf32> -> vector<4x1xf32>
    %16 = vector.broadcast %15 : vector<4x1xf32> to vector<4x4xf32>
    %17 = arith.mulf %12, %16 : vector<4x4xf32>
    %18 = arith.truncf %17 : vector<4x4xf32> to vector<4x4xbf16>
    %cst_5 = arith.constant dense<0.000000e+00> : vector<4x64xf32>
    %19 = tpu.matmul %18, %4, %cst_5 {dimension_numbers = #tpu.dot_dimension_numbers<[1], [0], [0], [1], [0, 0, 1, 1], [], []>} : vector<4x4xbf16>, vector<4x64xbf16>, vector<4x64xf32> -> vector<4x64xf32>
    %20 = arith.truncf %19 : vector<4x64xf32> to vector<4x64xbf16>
    %c0_6 = arith.constant 0 : index
    %c0_7 = arith.constant 0 : index
    %21 = vector.load %arg6[%c0_6, %c0_7] : memref<4x64xbf16, #tpu.memory_space<vmem>>, vector<4x64xbf16>
    tpu.vector_store %arg6[%c0_6, %c0_7], %20 {strides = array<i32>} : memref<4x64xbf16, #tpu.memory_space<vmem>>, vector<4x64xbf16>,
    %c0_8 = arith.constant 0 : index
    %c0_9 = arith.constant 0 : index
    %22 = vector.load %arg6[%c0_8, %c0_9] : memref<4x64xbf16, #tpu.memory_space<vmem>>, vector<4x64xbf16>
    %c0_10 = arith.constant 0 : index
    %c0_11 = arith.constant 0 : index
    %23 = vector.load %arg2[%c0_10, %c0_11] : memref<64x64xbf16, #tpu.memory_space<vmem>>, vector<64x64xbf16>
    %cst_12 = arith.constant dense<0.000000e+00> : vector<4x64xf32>
    %24 = tpu.matmul %22, %23, %cst_12 {dimension_numbers = #tpu.dot_dimension_numbers<[1], [0], [0], [1], [0, 0, 1, 1], [], []>} : vector<4x64xbf16>, vector<64x64xbf16>, vector<4x64xf32> -> vector<4x64xf32>
    %c0_13 = arith.constant 0 : index
    %c0_14 = arith.constant 0 : index
    %25 = vector.load %arg3[%c0_13, %c0_14] : memref<1x64xf32, #tpu.memory_space<vmem>>, vector<1x64xf32>
    %26 = vector.broadcast %25 : vector<1x64xf32> to vector<4x64xf32>
    %27 = arith.addf %24, %26 : vector<4x64xf32>
    %c0_15 = arith.constant 0 : index
    %c0_16 = arith.constant 0 : index
    %c0_17 = arith.constant 0 : index
    %28 = vector.load %arg4[%c0_15, %c0_16, %c0_17] : memref<1x4x64xf32, #tpu.memory_space<vmem>>, vector<1x4x64xf32>
    %29 = vector.shape_cast %28 : vector<1x4x64xf32> to vector<4x64xf32>
    %30 = arith.addf %27, %29 : vector<4x64xf32>
    %c0_18 = arith.constant 0 : index
    %c0_19 = arith.constant 0 : index
    %c0_20 = arith.constant 0 : index
    %31 = vector.load %arg5[%c0_18, %c0_19, %c0_20] : memref<1x4x64xf32, #tpu.memory_space<vmem>>, vector<1x4x64xf32>
    %32 = vector.shape_cast %31 : vector<1x4x64xf32> to vector<4x64xf32>
    %33 = vector.shape_cast %30 : vector<4x64xf32> to vector<1x4x64xf32>
    tpu.vector_store %arg5[%c0_18, %c0_19, %c0_20], %33 {strides = array<i32>} : memref<1x4x64xf32, #tpu.memory_space<vmem>>, vector<1x4x64xf32>,
    return
  }
  func.func @transform_0(%arg0: i32) -> (i32, i32, i32) {
    %c0_i32 = arith.constant 0 : i32
    %c0_i32_0 = arith.constant 0 : i32
    %c0_i32_1 = arith.constant 0 : i32
    return %arg0, %c0_i32, %c0_i32_0 : i32, i32, i32
  }
  func.func @transform_1(%arg0: i32) -> (i32, i32) {
    %c0_i32 = arith.constant 0 : i32
    %c0_i32_0 = arith.constant 0 : i32
    %c0_i32_1 = arith.constant 0 : i32
    return %c0_i32, %c0_i32_0 : i32, i32
  }
  func.func @transform_2(%arg0: i32) -> (i32, i32) {
    %c0_i32 = arith.constant 0 : i32
    %c0_i32_0 = arith.constant 0 : i32
    %c0_i32_1 = arith.constant 0 : i32
    return %c0_i32, %c0_i32_0 : i32, i32
  }
  func.func @transform_3(%arg0: i32) -> (i32, i32, i32) {
    %c0_i32 = arith.constant 0 : i32
    %c0_i32_0 = arith.constant 0 : i32
    %c0_i32_1 = arith.constant 0 : i32
    return %arg0, %c0_i32, %c0_i32_0 : i32, i32, i32
  }
  func.func @transform_4(%arg0: i32) -> (i32, i32, i32) {
    %c0_i32 = arith.constant 0 : i32
    %c0_i32_0 = arith.constant 0 : i32
    %c0_i32_1 = arith.constant 0 : i32
    return %arg0, %c0_i32, %c0_i32_0 : i32, i32, i32
  }
}

module attributes {stable_mosaic.version = 11 : i64} {
  func.func @kernel(%arg0: i32, %arg1: memref<8x64xf32, #tpu.memory_space<vmem>>, %arg2: memref<1x64xf32, #tpu.memory_space<vmem>>, %arg3: memref<1x64xf32, #tpu.memory_space<vmem>>, %arg4: memref<8x64xf32, #tpu.memory_space<vmem>>) attributes {dimension_semantics = [#tpu.dimension_semantics<parallel>], iteration_bounds = array<i64: 1>, scalar_prefetch = 0 : i64, scratch_operands = 0 : i64, tpu.core_type = #tpu.core_type<tc>, window_params = [{transform_indices = @transform_0, window_bounds = array<i64: 8, 64>}, {pipeline_mode = #tpu.pipeline_mode<synchronous>, transform_indices = @transform_1, window_bounds = array<i64: 1, 64>}, {pipeline_mode = #tpu.pipeline_mode<synchronous>, transform_indices = @transform_2, window_bounds = array<i64: 1, 64>}, {transform_indices = @transform_3, window_bounds = array<i64: 8, 64>}]} {
    %c0 = arith.constant 0 : index
    %c0_0 = arith.constant 0 : index
    %0 = vector.load %arg1[%c0, %c0_0] : memref<8x64xf32, #tpu.memory_space<vmem>>, vector<8x64xf32>
    %cst = arith.constant dense<0.000000e+00> : vector<8xf32>
    %1 = vector.multi_reduction <add>, %0, %cst [1] : vector<8x64xf32> to vector<8xf32>
    %2 = vector.shape_cast %1 : vector<8xf32> to vector<8x1xf32>
    %cst_1 = arith.constant 6.400000e+01 : f32
    %3 = vector.broadcast %cst_1 : f32 to vector<8x1xf32>
    %4 = arith.divf %2, %3 : vector<8x1xf32>
    %5 = vector.broadcast %4 : vector<8x1xf32> to vector<8x64xf32>
    %6 = arith.subf %0, %5 : vector<8x64xf32>
    %7 = arith.mulf %6, %6 : vector<8x64xf32>
    %cst_2 = arith.constant dense<0.000000e+00> : vector<8xf32>
    %8 = vector.multi_reduction <add>, %7, %cst_2 [1] : vector<8x64xf32> to vector<8xf32>
    %9 = vector.shape_cast %8 : vector<8xf32> to vector<8x1xf32>
    %cst_3 = arith.constant 6.400000e+01 : f32
    %10 = vector.broadcast %cst_3 : f32 to vector<8x1xf32>
    %11 = arith.divf %9, %10 : vector<8x1xf32>
    %12 = vector.broadcast %4 : vector<8x1xf32> to vector<8x64xf32>
    %13 = arith.subf %0, %12 : vector<8x64xf32>
    %cst_4 = arith.constant 9.99999974E-6 : f32
    %14 = vector.broadcast %cst_4 : f32 to vector<8x1xf32>
    %15 = arith.addf %11, %14 : vector<8x1xf32>
    %16 = math.rsqrt %15 : vector<8x1xf32>
    %17 = vector.broadcast %16 : vector<8x1xf32> to vector<8x64xf32>
    %18 = arith.mulf %13, %17 : vector<8x64xf32>
    %c0_5 = arith.constant 0 : index
    %c0_6 = arith.constant 0 : index
    %19 = vector.load %arg2[%c0_5, %c0_6] : memref<1x64xf32, #tpu.memory_space<vmem>>, vector<1x64xf32>
    %20 = vector.broadcast %19 : vector<1x64xf32> to vector<8x64xf32>
    %21 = arith.mulf %18, %20 : vector<8x64xf32>
    %c0_7 = arith.constant 0 : index
    %c0_8 = arith.constant 0 : index
    %22 = vector.load %arg3[%c0_7, %c0_8] : memref<1x64xf32, #tpu.memory_space<vmem>>, vector<1x64xf32>
    %23 = vector.broadcast %22 : vector<1x64xf32> to vector<8x64xf32>
    %24 = arith.addf %21, %23 : vector<8x64xf32>
    %c0_9 = arith.constant 0 : index
    %c0_10 = arith.constant 0 : index
    %25 = vector.load %arg4[%c0_9, %c0_10] : memref<8x64xf32, #tpu.memory_space<vmem>>, vector<8x64xf32>
    tpu.vector_store %arg4[%c0_9, %c0_10], %24 {strides = array<i32>} : memref<8x64xf32, #tpu.memory_space<vmem>>, vector<8x64xf32>,
    return
  }
  func.func @transform_0(%arg0: i32) -> (i32, i32) {
    %c0_i32 = arith.constant 0 : i32
    %c0_i32_0 = arith.constant 0 : i32
    return %arg0, %c0_i32 : i32, i32
  }
  func.func @transform_1(%arg0: i32) -> (i32, i32) {
    %c0_i32 = arith.constant 0 : i32
    %c0_i32_0 = arith.constant 0 : i32
    %c0_i32_1 = arith.constant 0 : i32
    return %c0_i32, %c0_i32_0 : i32, i32
  }
  func.func @transform_2(%arg0: i32) -> (i32, i32) {
    %c0_i32 = arith.constant 0 : i32
    %c0_i32_0 = arith.constant 0 : i32
    %c0_i32_1 = arith.constant 0 : i32
    return %c0_i32, %c0_i32_0 : i32, i32
  }
  func.func @transform_3(%arg0: i32) -> (i32, i32) {
    %c0_i32 = arith.constant 0 : i32
    %c0_i32_0 = arith.constant 0 : i32
    return %arg0, %c0_i32 : i32, i32
  }
}

module attributes {stable_mosaic.version = 11 : i64} {
  func.func @kernel(%arg0: i32, %arg1: i32, %arg2: i32, %arg3: memref<8x64xf32, #tpu.memory_space<vmem>>, %arg4: memref<64x256xbf16, #tpu.memory_space<vmem>>, %arg5: memref<1x256xf32, #tpu.memory_space<vmem>>, %arg6: memref<8x256xf32, #tpu.memory_space<vmem>>, %arg7: memref<8x256xf32, #tpu.memory_space<vmem>>) attributes {dimension_semantics = [#tpu.dimension_semantics<parallel>, #tpu.dimension_semantics<parallel>, #tpu.dimension_semantics<arbitrary>], iteration_bounds = array<i64: 1, 3, 1>, scalar_prefetch = 0 : i64, scratch_operands = 1 : i64, tpu.core_type = #tpu.core_type<tc>, window_params = [{transform_indices = @transform_0, window_bounds = array<i64: 8, 64>}, {transform_indices = @transform_1, window_bounds = array<i64: 64, 256>}, {transform_indices = @transform_2, window_bounds = array<i64: 1, 256>}, {transform_indices = @transform_3, window_bounds = array<i64: 8, 256>}]} {
    %c0_i32 = arith.constant 0 : i32
    %0 = arith.cmpi eq, %arg2, %c0_i32 : i32
    %1 = arith.extui %0 : i1 to i32
    %c0_i32_0 = arith.constant 0 : i32
    %2 = arith.cmpi ne, %1, %c0_i32_0 : i32
    scf.if %2 {
      %cst_10 = arith.constant 0.000000e+00 : f32
      %13 = vector.broadcast %cst_10 : f32 to vector<8x256xf32>
      %c0_11 = arith.constant 0 : index
      %c0_12 = arith.constant 0 : index
      %14 = vector.load %arg7[%c0_11, %c0_12] : memref<8x256xf32, #tpu.memory_space<vmem>>, vector<8x256xf32>
      tpu.vector_store %arg7[%c0_11, %c0_12], %13 {strides = array<i32>} : memref<8x256xf32, #tpu.memory_space<vmem>>, vector<8x256xf32>,
    } else {
    }
    %c0 = arith.constant 0 : index
    %c0_1 = arith.constant 0 : index
    %3 = vector.load %arg7[%c0, %c0_1] : memref<8x256xf32, #tpu.memory_space<vmem>>, vector<8x256xf32>
    %c0_2 = arith.constant 0 : index
    %c0_3 = arith.constant 0 : index
    %4 = vector.load %arg3[%c0_2, %c0_3] : memref<8x64xf32, #tpu.memory_space<vmem>>, vector<8x64xf32>
    %5 = arith.truncf %4 : vector<8x64xf32> to vector<8x64xbf16>
    %c0_4 = arith.constant 0 : index
    %c0_5 = arith.constant 0 : index
    %6 = vector.load %arg4[%c0_4, %c0_5] : memref<64x256xbf16, #tpu.memory_space<vmem>>, vector<64x256xbf16>
    %cst = arith.constant dense<0.000000e+00> : vector<8x256xf32>
    %7 = tpu.matmul %5, %6, %cst {dimension_numbers = #tpu.dot_dimension_numbers<[1], [0], [0], [1], [0, 0, 1, 1], [], []>} : vector<8x64xbf16>, vector<64x256xbf16>, vector<8x256xf32> -> vector<8x256xf32>
    %8 = arith.addf %3, %7 : vector<8x256xf32>
    %c0_6 = arith.constant 0 : index
    %c0_7 = arith.constant 0 : index
    %9 = vector.load %arg7[%c0_6, %c0_7] : memref<8x256xf32, #tpu.memory_space<vmem>>, vector<8x256xf32>
    tpu.vector_store %arg7[%c0_6, %c0_7], %8 {strides = array<i32>} : memref<8x256xf32, #tpu.memory_space<vmem>>, vector<8x256xf32>,
    %c0_i32_8 = arith.constant 0 : i32
    %10 = arith.cmpi eq, %arg2, %c0_i32_8 : i32
    %11 = arith.extui %10 : i1 to i32
    %c0_i32_9 = arith.constant 0 : i32
    %12 = arith.cmpi ne, %11, %c0_i32_9 : i32
    scf.if %12 {
      %c0_10 = arith.constant 0 : index
      %c0_11 = arith.constant 0 : index
      %13 = vector.load %arg7[%c0_10, %c0_11] : memref<8x256xf32, #tpu.memory_space<vmem>>, vector<8x256xf32>
      %c0_12 = arith.constant 0 : index
      %c0_13 = arith.constant 0 : index
      %14 = vector.load %arg5[%c0_12, %c0_13] : memref<1x256xf32, #tpu.memory_space<vmem>>, vector<1x256xf32>
      %15 = vector.broadcast %14 : vector<1x256xf32> to vector<8x256xf32>
      %16 = arith.addf %13, %15 : vector<8x256xf32>
      %c0_14 = arith.constant 0 : index
      %c0_15 = arith.constant 0 : index
      %17 = vector.load %arg6[%c0_14, %c0_15] : memref<8x256xf32, #tpu.memory_space<vmem>>, vector<8x256xf32>
      tpu.vector_store %arg6[%c0_14, %c0_15], %16 {strides = array<i32>} : memref<8x256xf32, #tpu.memory_space<vmem>>, vector<8x256xf32>,
    } else {
    }
    return
  }
  func.func @transform_0(%arg0: i32, %arg1: i32, %arg2: i32) -> (i32, i32) {
    %c0_i32 = arith.constant 0 : i32
    return %arg0, %arg2 : i32, i32
  }
  func.func @transform_1(%arg0: i32, %arg1: i32, %arg2: i32) -> (i32, i32) {
    %c0_i32 = arith.constant 0 : i32
    return %arg2, %arg1 : i32, i32
  }
  func.func @transform_2(%arg0: i32, %arg1: i32, %arg2: i32) -> (i32, i32) {
    %c0_i32 = arith.constant 0 : i32
    %c0_i32_0 = arith.constant 0 : i32
    return %c0_i32, %arg1 : i32, i32
  }
  func.func @transform_3(%arg0: i32, %arg1: i32, %arg2: i32) -> (i32, i32) {
    %c0_i32 = arith.constant 0 : i32
    return %arg0, %arg1 : i32, i32
  }
}

module attributes {stable_mosaic.version = 11 : i64} {
  func.func @kernel(%arg0: i32, %arg1: memref<2x256xf32, #tpu.memory_space<vmem>>, %arg2: memref<2x4xf32, #tpu.memory_space<smem>>, %arg3: memref<2x16xf32, #tpu.memory_space<smem>>, %arg4: memref<1x1x256xf32, #tpu.memory_space<vmem>>, %arg5: memref<1x3x256xf32, #tpu.memory_space<vmem>>) attributes {dimension_semantics = [#tpu.dimension_semantics<parallel>], iteration_bounds = array<i64: 2>, scalar_prefetch = 0 : i64, scratch_operands = 0 : i64, tpu.core_type = #tpu.core_type<tc>, window_params = [{pipeline_mode = #tpu.pipeline_mode<synchronous>, transform_indices = @transform_0, window_bounds = array<i64: 2, 256>}, {transform_indices = @transform_1, window_bounds = array<i64: 2, 4>}, {transform_indices = @transform_2, window_bounds = array<i64: 2, 16>}, {transform_indices = @transform_3, window_bounds = array<i64: 1, 1, 256>}, {transform_indices = @transform_4, window_bounds = array<i64: 1, 3, 256>}]} {
    %c0 = arith.constant 0 : index
    %c0_0 = arith.constant 0 : index
    %0 = vector.load %arg1[%c0, %c0_0] : memref<2x256xf32, #tpu.memory_space<vmem>>, vector<1x256xf32>
    %c1 = arith.constant 1 : index
    %c0_1 = arith.constant 0 : index
    %1 = vector.load %arg1[%c1, %c0_1] : memref<2x256xf32, #tpu.memory_space<vmem>>, vector<1x256xf32>
    %2 = arith.index_cast %arg0 : i32 to index
    %c0_2 = arith.constant 0 : index
    %3 = memref.load %arg2[%2, %c0_2] : memref<2x4xf32, #tpu.memory_space<smem>>
    %4 = arith.index_cast %arg0 : i32 to index
    %c1_3 = arith.constant 1 : index
    %5 = memref.load %arg2[%4, %c1_3] : memref<2x4xf32, #tpu.memory_space<smem>>
    %6 = arith.index_cast %arg0 : i32 to index
    %c2 = arith.constant 2 : index
    %7 = memref.load %arg2[%6, %c2] : memref<2x4xf32, #tpu.memory_space<smem>>
    %8 = arith.index_cast %arg0 : i32 to index
    %c3 = arith.constant 3 : index
    %9 = memref.load %arg2[%8, %c3] : memref<2x4xf32, #tpu.memory_space<smem>>
    %cst = arith.constant 5.000000e-01 : f32
    %10 = vector.broadcast %cst : f32 to vector<1x256xf32>
    %11 = arith.addf %0, %10 : vector<1x256xf32>
    %12 = vector.broadcast %7 : f32 to vector<1x256xf32>
    %13 = arith.subf %11, %12 : vector<1x256xf32>
    %14 = vector.broadcast %3 : f32 to vector<1x256xf32>
    %15 = arith.divf %13, %14 : vector<1x256xf32>
    %cst_4 = arith.constant 5.000000e-01 : f32
    %16 = vector.broadcast %cst_4 : f32 to vector<1x256xf32>
    %17 = arith.addf %1, %16 : vector<1x256xf32>
    %18 = vector.broadcast %9 : f32 to vector<1x256xf32>
    %19 = arith.subf %17, %18 : vector<1x256xf32>
    %20 = vector.broadcast %5 : f32 to vector<1x256xf32>
    %21 = arith.divf %19, %20 : vector<1x256xf32>
    %cst_5 = arith.constant 1.000000e+00 : f32
    %22 = vector.broadcast %cst_5 : f32 to vector<1x256xf32>
    %23 = arith.index_cast %arg0 : i32 to index
    %c0_6 = arith.constant 0 : index
    %24 = memref.load %arg3[%23, %c0_6] : memref<2x16xf32, #tpu.memory_space<smem>>
    %25 = vector.broadcast %24 : f32 to vector<1x256xf32>
    %26 = arith.mulf %15, %25 : vector<1x256xf32>
    %27 = arith.index_cast %arg0 : i32 to index
    %c1_7 = arith.constant 1 : index
    %28 = memref.load %arg3[%27, %c1_7] : memref<2x16xf32, #tpu.memory_space<smem>>
    %29 = vector.broadcast %28 : f32 to vector<1x256xf32>
    %30 = arith.mulf %21, %29 : vector<1x256xf32>
    %31 = arith.addf %26, %30 : vector<1x256xf32>
    %32 = arith.index_cast %arg0 : i32 to index
    %c2_8 = arith.constant 2 : index
    %33 = memref.load %arg3[%32, %c2_8] : memref<2x16xf32, #tpu.memory_space<smem>>
    %34 = vector.broadcast %33 : f32 to vector<1x256xf32>
    %35 = arith.mulf %22, %34 : vector<1x256xf32>
    %36 = arith.addf %31, %35 : vector<1x256xf32>
    %37 = arith.index_cast %arg0 : i32 to index
    %c4 = arith.constant 4 : index
    %38 = memref.load %arg3[%37, %c4] : memref<2x16xf32, #tpu.memory_space<smem>>
    %39 = vector.broadcast %38 : f32 to vector<1x256xf32>
    %40 = arith.mulf %15, %39 : vector<1x256xf32>
    %41 = arith.index_cast %arg0 : i32 to index
    %c5 = arith.constant 5 : index
    %42 = memref.load %arg3[%41, %c5] : memref<2x16xf32, #tpu.memory_space<smem>>
    %43 = vector.broadcast %42 : f32 to vector<1x256xf32>
    %44 = arith.mulf %21, %43 : vector<1x256xf32>
    %45 = arith.addf %40, %44 : vector<1x256xf32>
    %46 = arith.index_cast %arg0 : i32 to index
    %c6 = arith.constant 6 : index
    %47 = memref.load %arg3[%46, %c6] : memref<2x16xf32, #tpu.memory_space<smem>>
    %48 = vector.broadcast %47 : f32 to vector<1x256xf32>
    %49 = arith.mulf %22, %48 : vector<1x256xf32>
    %50 = arith.addf %45, %49 : vector<1x256xf32>
    %51 = arith.index_cast %arg0 : i32 to index
    %c8 = arith.constant 8 : index
    %52 = memref.load %arg3[%51, %c8] : memref<2x16xf32, #tpu.memory_space<smem>>
    %53 = vector.broadcast %52 : f32 to vector<1x256xf32>
    %54 = arith.mulf %15, %53 : vector<1x256xf32>
    %55 = arith.index_cast %arg0 : i32 to index
    %c9 = arith.constant 9 : index
    %56 = memref.load %arg3[%55, %c9] : memref<2x16xf32, #tpu.memory_space<smem>>
    %57 = vector.broadcast %56 : f32 to vector<1x256xf32>
    %58 = arith.mulf %21, %57 : vector<1x256xf32>
    %59 = arith.addf %54, %58 : vector<1x256xf32>
    %60 = arith.index_cast %arg0 : i32 to index
    %c10 = arith.constant 10 : index
    %61 = memref.load %arg3[%60, %c10] : memref<2x16xf32, #tpu.memory_space<smem>>
    %62 = vector.broadcast %61 : f32 to vector<1x256xf32>
    %63 = arith.mulf %22, %62 : vector<1x256xf32>
    %64 = arith.addf %59, %63 : vector<1x256xf32>
    %65 = arith.mulf %36, %36 : vector<1x256xf32>
    %66 = arith.mulf %50, %50 : vector<1x256xf32>
    %67 = arith.addf %65, %66 : vector<1x256xf32>
    %68 = arith.mulf %64, %64 : vector<1x256xf32>
    %69 = arith.addf %67, %68 : vector<1x256xf32>
    %70 = math.rsqrt %69 : vector<1x256xf32>
    %71 = arith.mulf %36, %70 : vector<1x256xf32>
    %72 = arith.mulf %50, %70 : vector<1x256xf32>
    %73 = arith.mulf %64, %70 : vector<1x256xf32>
    %74 = arith.index_cast %arg0 : i32 to index
    %c3_9 = arith.constant 3 : index
    %75 = memref.load %arg3[%74, %c3_9] : memref<2x16xf32, #tpu.memory_space<smem>>
    %76 = arith.index_cast %arg0 : i32 to index
    %c7 = arith.constant 7 : index
    %77 = memref.load %arg3[%76, %c7] : memref<2x16xf32, #tpu.memory_space<smem>>
    %78 = arith.index_cast %arg0 : i32 to index
    %c11 = arith.constant 11 : index
    %79 = memref.load %arg3[%78, %c11] : memref<2x16xf32, #tpu.memory_space<smem>>
    %c0_10 = arith.constant 0 : index
    %c0_11 = arith.constant 0 : index
    %c0_12 = arith.constant 0 : index
    %80 = vector.load %arg4[%c0_10, %c0_11, %c0_12] : memref<1x1x256xf32, #tpu.memory_space<vmem>>, vector<1x1x256xf32>
    %81 = vector.shape_cast %80 : vector<1x1x256xf32> to vector<1x256xf32>
    %82 = arith.mulf %81, %71 : vector<1x256xf32>
    %83 = vector.broadcast %75 : f32 to vector<1x256xf32>
    %84 = arith.addf %83, %82 : vector<1x256xf32>
    %c0_13 = arith.constant 0 : index
    %c0_14 = arith.constant 0 : index
    %c0_15 = arith.constant 0 : index
    %85 = vector.load %arg5[%c0_13, %c0_14, %c0_15] : memref<1x3x256xf32, #tpu.memory_space<vmem>>, vector<1x1x256xf32>
    %86 = vector.shape_cast %85 : vector<1x1x256xf32> to vector<1x256xf32>
    %87 = vector.shape_cast %84 : vector<1x256xf32> to vector<1x1x256xf32>
    tpu.vector_store %arg5[%c0_13, %c0_14, %c0_15], %87 {strides = array<i32>} : memref<1x3x256xf32, #tpu.memory_space<vmem>>, vector<1x1x256xf32>,
    %88 = arith.mulf %81, %72 : vector<1x256xf32>
    %89 = vector.broadcast %77 : f32 to vector<1x256xf32>
    %90 = arith.addf %89, %88 : vector<1x256xf32>
    %c0_16 = arith.constant 0 : index
    %c1_17 = arith.constant 1 : index
    %c0_18 = arith.constant 0 : index
    %91 = vector.load %arg5[%c0_16, %c1_17, %c0_18] : memref<1x3x256xf32, #tpu.memory_space<vmem>>, vector<1x1x256xf32>
    %92 = vector.shape_cast %91 : vector<1x1x256xf32> to vector<1x256xf32>
    %93 = vector.shape_cast %90 : vector<1x256xf32> to vector<1x1x256xf32>
    tpu.vector_store %arg5[%c0_16, %c1_17, %c0_18], %93 {strides = array<i32>} : memref<1x3x256xf32, #tpu.memory_space<vmem>>, vector<1x1x256xf32>,
    %94 = arith.mulf %81, %73 : vector<1x256xf32>
    %95 = vector.broadcast %79 : f32 to vector<1x256xf32>
    %96 = arith.addf %95, %94 : vector<1x256xf32>
    %c0_19 = arith.constant 0 : index
    %c2_20 = arith.constant 2 : index
    %c0_21 = arith.constant 0 : index
    %97 = vector.load %arg5[%c0_19, %c2_20, %c0_21] : memref<1x3x256xf32, #tpu.memory_space<vmem>>, vector<1x1x256xf32>
    %98 = vector.shape_cast %97 : vector<1x1x256xf32> to vector<1x256xf32>
    %99 = vector.shape_cast %96 : vector<1x256xf32> to vector<1x1x256xf32>
    tpu.vector_store %arg5[%c0_19, %c2_20, %c0_21], %99 {strides = array<i32>} : memref<1x3x256xf32, #tpu.memory_space<vmem>>, vector<1x1x256xf32>,
    return
  }
  func.func @transform_0(%arg0: i32) -> (i32, i32) {
    %c0_i32 = arith.constant 0 : i32
    %c0_i32_0 = arith.constant 0 : i32
    %c0_i32_1 = arith.constant 0 : i32
    return %c0_i32, %c0_i32_0 : i32, i32
  }
  func.func @transform_1(%arg0: i32) -> (i32, i32) {
    %c0_i32 = arith.constant 0 : i32
    %c0_i32_0 = arith.constant 0 : i32
    %c0_i32_1 = arith.constant 0 : i32
    return %c0_i32, %c0_i32_0 : i32, i32
  }
  func.func @transform_2(%arg0: i32) -> (i32, i32) {
    %c0_i32 = arith.constant 0 : i32
    %c0_i32_0 = arith.constant 0 : i32
    %c0_i32_1 = arith.constant 0 : i32
    return %c0_i32, %c0_i32_0 : i32, i32
  }
  func.func @transform_3(%arg0: i32) -> (i32, i32, i32) {
    %c0_i32 = arith.constant 0 : i32
    %c0_i32_0 = arith.constant 0 : i32
    %c0_i32_1 = arith.constant 0 : i32
    return %arg0, %c0_i32, %c0_i32_0 : i32, i32, i32
  }
  func.func @transform_4(%arg0: i32) -> (i32, i32, i32) {
    %c0_i32 = arith.constant 0 : i32
    %c0_i32_0 = arith.constant 0 : i32
    %c0_i32_1 = arith.constant 0 : i32
    return %arg0, %c0_i32, %c0_i32_0 : i32, i32, i32
  }
}

</mosaic_0001>

<bundles_post_ra>
// kernel: vit_gs_encoder_forward.11
= control target key start
LH: loop header
LB: loop body
LE: loop exit
PB: predicated region body
PF: predicated region fallthrough
CT: control target
= control target key end

     0   :  { %8 = vsyncpa [#allocation3], 0  ;;  %s573_s0 = inlined_call_operand.vmem [shape: f32[2,256], index: 0, kind: input, shape index: {}]   ;;  %s574_s1 = inlined_call_operand.vmem [shape: f32[2,4], index: 1, kind: input, shape index: {}]   ;;  %s575_s2 = inlined_call_operand.vmem [shape: f32[2,16], index: 2, kind: input, shape index: {}]   ;;  %s576_s3 = inlined_call_operand.vmem [shape: f32[2,6,256], index: 3, kind: output, shape index: {}]  }
   0x1   :  { %9 = vsyncpa [#allocation5], 0  ;;  %s472_s12 = smov 0  }
   0x2 LB: > { %s478_s13 = sadd.s32 4294967295, %s448_s12   ;;  %p351_p0 = scmp.ge.s32.totalorder %s448_s12, 1  ;;  %s448_s12 = sphi %s472_s12, %s15_s12  }
   0x3   : > { %p109_p1 = scmp.lt.s32.totalorder %s448_s12, 3  ;;  %s125_s16 = sshll.u32 %s574_s1, 4  ;;  %s126_s16 = int_to_ptr.vmem [resolvable:$true] %s125_s16 }
   0x4   : > { %p577_p3 = scmp.eq.s32.totalorder %s478_s13, 0  ;;  %s136_s20 = sshll.u32 %s575_s2, 4  ;;  %s137_s20 = int_to_ptr.vmem [resolvable:$true] %s136_s20 }
   0x5   : > { %p485_p2 = pnand %p351_p0, %p109_p1  ;;  %s404_s22 = scalar_lea.vmem %s126_s16, 32 }
   0x6   : > { %p405_p6 = scmp.ne.s32.totalorder %s126_s16, %s404_s22  ;;  %p412_p10 = scmp.lt.s32.totalorder %s126_s16, %s126_s16 }
   0x7   : > { %s579_s17 = scalar_select %p485_p2, 1, 0 }
   0x8   : > { %p377_p4 = pneg %p485_p2  ;;  %p413_p11 = scmp.lt.s32.totalorder %s404_s22, %s404_s22 }
   0xa   : > { %p497_p5 = pnand %p577_p3, %p377_p4  ;;  %p414_p12 = por %p413_p11, %p412_p10 }
   0xc   : > { %p406_p7 = pneg %p497_p5 }
   0xe   : > { %p407_p8 = pnand %p406_p7, %p405_p6 }
  0x10   : > { %p408_p9 = pneg %p407_p8 }
  0x12   : > { %p415_p13 = pnand %p414_p12, %p408_p9 }
  0x14   : > { %418 = shalt.err (!%p415_p13)
}
  0x15   : > { %s450_s23 = smov [#allocation2]   ;;  %s419_s24 = scalar_lea.vmem %s137_s20, 32 }
  0x16   : > { %380 = dma.vmem_to_smem (!%p497_p5), %s126_s16, 32, %s450_s23, [#allocation3]  }
  0x17   : > { %p420_p0 = scmp.ne.s32.totalorder %s137_s20, %s419_s24  ;;  %p427_p3 = scmp.lt.s32.totalorder %s137_s20, %s137_s20 }
  0x18   : > { %p428_p2 = scmp.lt.s32.totalorder %s419_s24, %s419_s24 }
  0x19   : > { %p422_p1 = pnand %p420_p0, %p406_p7 }
  0x1a   : > { %p429_p6 = por %p428_p2, %p427_p3 }
  0x1b   : > { %p423_p4 = pneg %p422_p1 }
  0x1d   : > { %p430_p8 = pnand %p429_p6, %p423_p4 }
  0x1f   : > { %433 = shalt.err (!%p430_p8)
}
  0x20   : > { %s451_s25 = smov [#allocation4]   ;;  %p581_p9 = scmp.ne.s32.totalorder %s579_s17, 0 }
  0x21   : > { %383 = dma.vmem_to_smem (!%p497_p5), %s137_s20, 32, %s451_s25, [#allocation5]  }
  0x22   : > { %149 = sbr.rel (%p581_p9) target bundleno = 101 (0x65), region = 32  ;;  %p582_p10 = scmp.eq.s32.totalorder (!%p581_p9), %s478_s13, 0 }
  0x29   : > { %439 = dma.done.wait (%p582_p10), [#allocation3], 32   ;;  %p583_p11 = pmov %p582_p10 }
  0x2a   : > { %p584_p7 = pmov %p582_p10 }
  0x2b   : > { %441 = vsyncadd (%p583_p11), [#allocation3], 4294967264 }
  0x2c   : > { %443 = dma.done.wait (%p584_p7), [#allocation5], 32   ;;  %p585_p2 = pmov %p584_p7 }
  0x2e   : > { %445 = vsyncadd (%p585_p2), [#allocation5], 4294967264 }
  0x2f   : > { %159 = sfence }
  0x30   : > { %s518_s26 = sshll.u32 %s478_s13, 7  ;;  %v178_v1 = vld [vmem:[%s573_s0] ss:$2 sm:$0x3]  ;;  %p173_p3 = scmp.lt.s32.totalorder %s478_s13, 1  ;;  %v256_v40 = vlaneseq }
  0x31   : > { %s182_s27 = sld [smem:[#allocation2 + %s518_s26]]  ;;  %s183_s28 = sadd.s32 1, %s518_s26  ;;  %v359_v3 = vld [vmem:[%s573_s0 + $0x1] ss:$2 sm:$0x3]  ;;  %v189_v4 = vadd.f32 0.5, %v178_v1 }
  0x32   : > { %s184_s29 = sld [smem:[#allocation2 + %s183_s28]]  ;;  %s185_s30 = sadd.s32 2, %s518_s26  ;;  %v195_v6 = vadd.f32 0.5, %v359_v3  ;;  %vm554_vm0 = vcmp.lt.s32.totalorder %v256_v40, 256 }
  0x33   : > { %s186_s4 = sld [smem:[#allocation2 + %s185_s30]]  ;;  %s187_s5 = sadd.s32 3, %s518_s26 }
  0x34   : > { %s188_s6 = sld [smem:[#allocation2 + %s187_s5]]  ;;  %s211_s9 = sadd.s32 4, %s518_s26 }
  0x35   : > { %s215_s10 = sadd.s32 5, %s518_s26  ;;  %s532_s11 = sld [smem:[#allocation4 + %s518_s26]] }
  0x36   : > { %s534_s14 = sld [smem:[#allocation4 + %s183_s28]]  ;;  %s224_s18 = sadd.s32 8, %s518_s26 }
  0x37   : > { %v192_v0 = vstv %s182_s27  ;;  %s212_s17 = sld [smem:[#allocation4 + %s211_s9]]  ;;  %s220_s21 = sadd.s32 6, %s518_s26 }
  0x38   : > { %398 = vrcp.f32 %v192_v0  ;;  %v198_v2 = vstv %s184_s29  ;;  %s216_s19 = sld [smem:[#allocation4 + %s215_s10]]  ;;  %s228_s22 = sadd.s32 9, %s518_s26 }
  0x39   : > { %400 = vrcp.f32 %v198_v2  ;;  %s225_s20 = sld [smem:[#allocation4 + %s224_s18]]  ;;  %v190_v5 = vstv %s186_s4  ;;  %s233_s24 = sadd.s32 10, %s518_s26 }
  0x3a   : > { %s229_s23 = sld [smem:[#allocation4 + %s228_s22]]  ;;  %v196_v7 = vstv %s188_s6  ;;  %v191_v8 = vsub.f32 %v189_v4, %v190_v5  ;;  %s247_s29 = sadd.s32 7, %s518_s26 }
  0x3b   : > { %s208_s25 = sld [smem:[#allocation4 + %s185_s30]]  ;;  %v197_v9 = vsub.f32 %v195_v6, %v196_v7  ;;  %v202_v11 = vstv %s532_s11  ;;  %s249_s30 = sadd.s32 11, %s518_s26 }
  0x3c   : > { %s221_s27 = sld [smem:[#allocation4 + %s220_s21]]  ;;  %v205_v16 = vstv %s534_s14  ;;  %s589_s13 = smov (!%p173_p3, %s478_s13), 1 }
  0x3d   : > { %s234_s28 = sld [smem:[#allocation4 + %s233_s24]]  ;;  %v213_v12 = vstv %s212_s17  ;;  %s368_s8 = sshll.u32 %s589_s13, 4 }
  0x3e   : > { %v217_v17 = vstv %s216_s19  ;;  %s248_s4 = sld [smem:[#allocation4 + %s247_s29]]  ;;  %s177_s11 = scalar_lea.vmem %s576_s3, %s368_s8 }
  0x3f   : > { %v226_v13 = vstv %s225_s20  ;;  %s250_s6 = sld [smem:[#allocation4 + %s249_s30]] }
  0x40   : > { %v230_v18 = vstv %s229_s23  ;;  %s246_s7 = sld [smem:[#allocation4 + %s187_s5]] }
  0x41   : > { %v209_v26 = vstv %s208_s25 }
  0x42   : > { %v399_v10 = vpop.eup %398  ;;  %v222_v27 = vstv %s221_s27 }
  0x43   : > { %v194_v14 = vmul.f32 %v399_v10, %v191_v8  ;;  %v401_v15 = vpop.eup %400  ;;  %v235_v28 = vstv %s234_s28 }
  0x44   : > { %v200_v19 = vmul.f32 %v401_v15, %v197_v9  ;;  %v251_v42 = vstv %s248_s4 }
  0x45   : > { %v203_v20 = vmul.f32 %v202_v11, %v194_v14  ;;  %v214_v21 = vmul.f32 %v213_v12, %v194_v14  ;;  %v227_v22 = vmul.f32 %v226_v13, %v194_v14  ;;  %v253_v43 = vstv %s250_s6 }
  0x46   : > { %v206_v23 = vmul.f32 %v205_v16, %v200_v19  ;;  %v218_v24 = vmul.f32 %v217_v17, %v200_v19  ;;  %v231_v25 = vmul.f32 %v230_v18, %v200_v19  ;;  %v263_v45 = vstv %s246_s7 }
  0x48   : > { %v207_v29 = vadd.f32 %v206_v23, %v203_v20  ;;  %v219_v30 = vadd.f32 %v218_v24, %v214_v21  ;;  %v232_v31 = vadd.f32 %v231_v25, %v227_v22 }
  0x4a   : > { %v210_v32 = vadd.f32 %v209_v26, %v207_v29  ;;  %v223_v33 = vadd.f32 %v222_v27, %v219_v30  ;;  %v236_v34 = vadd.f32 %v235_v28, %v232_v31 }
  0x4c   : > { %v237_v35 = vmul.f32 %v210_v32, %v210_v32  ;;  %v238_v36 = vmul.f32 %v223_v33, %v223_v33  ;;  %v240_v37 = vmul.f32 %v236_v34, %v236_v34 }
  0x4e   : > { %v239_v38 = vadd.f32 %v238_v36, %v237_v35 }
  0x50   : > { %v241_v39 = vadd.f32 %v240_v37, %v239_v38 }
  0x52   : > { %402 = vrsqrt.f32 %v241_v39 }
  0x5c   : > { %v403_v41 = vpop.eup %402 }
  0x5d   : > { %v244_v46 = vmul.f32 %v403_v41, %v223_v33  ;;  %v245_v47 = vmul.f32 %v403_v41, %v236_v34  ;;  %v243_v48 = vmul.f32 %v403_v41, %v210_v32 }
  0x5f   : > { %v252_v49 = vmul.f32 %v251_v42, %v245_v47  ;;  %v254_v50 = vmul.f32 %v253_v43, %v244_v46  ;;  %364 = vst.msk [vmem:[%s177_s11 + $0x4] ss:$8 sm:$0x3] %vm554_vm0, %v244_v46  ;;  %365 = vst.msk [vmem:[%s177_s11 + $0x5] ss:$8 sm:$0x3] %vm554_vm0, %v245_v47  ;;  %v262_v51 = vmul.f32 %v253_v43, %v243_v48 }
  0x60   : > { %v264_v52 = vmul.f32 %v263_v45, %v245_v47  ;;  %363 = vst.msk [vmem:[%s177_s11 + $0x3] ss:$8 sm:$0x3] %vm554_vm0, %v243_v48  ;;  %v269_v53 = vmul.f32 %v263_v45, %v244_v46  ;;  %v270_v54 = vmul.f32 %v251_v42, %v243_v48 }
  0x61   : > { %v255_v55 = vsub.f32 %v252_v49, %v254_v50 }
  0x62   : > { %v265_v56 = vsub.f32 %v262_v51, %v264_v52  ;;  %v271_v57 = vsub.f32 %v269_v53, %v270_v54 }
  0x63   : > { %260 = vst.msk [vmem:[%s177_s11] ss:$8 sm:$0x3] %vm554_vm0, %v255_v55 }
  0x64   : > { %361 = vst.msk [vmem:[%s177_s11 + $0x1] ss:$8 sm:$0x3] %vm554_vm0, %v265_v56  ;;  %362 = vst.msk [vmem:[%s177_s11 + $0x2] ss:$8 sm:$0x3] %vm554_vm0, %v271_v57 }
  0x65 PF: > { %s15_s12 = sadd.s32 1, %s448_s12  }
  0x66   : > { %p12_p5 = scmp.ge.s32.totalorder %s15_s12, 4  }
  0x68   :  { %14 = sbr.rel (!%p12_p5) target bundleno = 2 (0x2), region = 74 }
  0x6f   :  { %305 = vsyncpa [#allocation3], 1 }
  0x70   :  { %307 = vsyncpa [#allocation3 + $0x1], 1 }
  0x71   :  { %308 = vsyncpa [#allocation5], 1 }

// kernel: vit_gs_encoder_forward.13
= control target key start
LH: loop header
LB: loop body
LE: loop exit
PB: predicated region body
PF: predicated region fallthrough
CT: control target
= control target key end

     0   :  { %vm22_vm0 = vcmask 523264   ;;  %v202_v15 = vmov 0   ;;  %v64_v26 = vlaneseq  ;;  %vm166_vm1 = vcmask 1043456   ;;  %s275_s0 = inlined_call_operand.vmem [shape: f32[8,64], index: 0, kind: input, shape index: {}]   ;;  %s276_s3 = inlined_call_operand.vmem [shape: bf16[64,192], index: 3, kind: input, shape index: {}]   ;;  %s277_s1 = inlined_call_operand.vmem [shape: f32[1,64], index: 1, kind: input, shape index: {}]   ;;  %s278_s2 = inlined_call_operand.vmem [shape: f32[1,64], index: 2, kind: input, shape index: {}]   ;;  %s279_s4 = inlined_call_operand.vmem [shape: f32[1,192], index: 4, kind: input, shape index: {}]   ;;  %s280_s5 = inlined_call_operand.vmem [shape: bf16[8,192], index: 5, kind: output, shape index: {}]  }
   0x1   :  { %v21_v0 = vld [vmem:[%s275_s0] sm:$0xff]  ;;  %v191_v9 = vld [vmem:[%s276_s3 + $0x14] ss:$8 sps:$4 sm:$0xff]   ;;  %v193_v10 = vld [vmem:[%s276_s3 + $0x10] ss:$8 sps:$4 sm:$0xff]   ;;  %149 = vmatprep.mubr.bf16.mxu0 %v202_v15  ;;  %vm167_vm2 = vcmask 523268  }
   0x2   :  { %v23_v1 = vsel %vm22_vm0, %v21_v0, 0.0  ;;  %v188_v7 = vld [vmem:[%s276_s3 + $0x4] ss:$8 sps:$4 sm:$0xff]   ;;  %v190_v8 = vld [vmem:[%s276_s3] ss:$8 sps:$4 sm:$0xff]   ;;  %v65_v27 = vshrl.u32 %v64_v26, 7  ;;  %vm168_vm3 = vmor %vm167_vm2, %vm166_vm1 }
   0x3   :  { %24 = vadd.xlane.f32.xlu0 %v23_v1  ;;  %117 = vmatprep.subr.bf16.mxu0 %v188_v7  ;;  %v194_v11 = vld [vmem:[%s276_s3 + $0x24] ss:$8 sps:$4 sm:$0xff]   ;;  %v196_v12 = vld [vmem:[%s276_s3 + $0x20] ss:$8 sps:$4 sm:$0xff]   ;;  %v197_v13 = vld [vmem:[%s276_s3 + $0x34] ss:$8 sps:$4 sm:$0xff]  }
   0x4   :  { %118 = vmatpush1.bf16.msra.mxu0 %v190_v8  ;;  %v199_v14 = vld [vmem:[%s276_s3 + $0x30] ss:$8 sps:$4 sm:$0xff]   ;;  %v174_v20 = vld [vmem:[%s277_s1] ss:$0 sm:$0xff]  ;;  %v66_v28 = vsub.s32 0, %v65_v27  ;;  %v70_v30 = vsub.s32 1, %v65_v27 }
   0x5   :  { %119 = vmatprep.subr.bf16.mxu0 %v191_v9  ;;  %v175_v22 = vld [vmem:[%s278_s2] ss:$0 sm:$0xff] }
   0x6   :  { %v62_v29 = vld [vmem:[%s279_s4] sm:$0x3] }
   0x7   :  { %v67_v31 = vrot.slane %v62_v29, %v66_v28  ;;  %v71_v32 = vrot.slane %v62_v29, %v70_v30 }
   0x8   :  { %120 = vmatpush1.bf16.msra.mxu0 %v193_v10 }
   0x9   :  { %121 = vmatprep.subr.bf16.mxu0 %v194_v11 }
   0xc   :  { %122 = vmatpush1.bf16.msra.mxu0 %v196_v12 }
   0xd   :  { %123 = vmatprep.subr.bf16.mxu0 %v197_v13 }
  0x10   :  { %124 = vmatpush1.bf16.msra.mxu0 %v199_v14 }
  0x90   :  { %v25_v2 = vpop.xlane.xlu0 %24 }
  0x91   :  { %v27_v3 = vmul.f32 0.015625, %v25_v2 }
  0x93   :  { %v28_v4 = vsub.f32 %v21_v0, %v27_v3 }
  0x95   :  { %v29_v5 = vmul.f32 %v28_v4, %v28_v4 }
  0x97   :  { %v30_v6 = vsel %vm22_vm0, %v29_v5, 0.0 }
  0x98   :  { %31 = vadd.xlane.f32.xlu0 %v30_v6 }
 0x125   :  { %v32_v16 = vpop.xlane.xlu0 %31 }
 0x126   :  { %v33_v17 = vmul.f32 0.015625, %v32_v16 }
 0x128   :  { %v34_v18 = vadd.f32 1e-05, %v33_v17 }
 0x12a   :  { %200 = vrsqrt.f32 %v34_v18 }
 0x134   :  { %v201_v19 = vpop.eup %200 }
 0x135   :  { %v36_v21 = vmul.f32 %v201_v19, %v28_v4 }
 0x137   :  { %v44_v23 = vmul.f32 %v174_v20, %v36_v21 }
 0x139   :  { %v52_v24 = vadd.f32 %v175_v22, %v44_v23 }
 0x13b   :  { %v53_v25 = vpack.c.bf16 %v52_v24, %v52_v24 }
 0x13d   :  { %184 = vmatmul.mubr.msk.bf16.vlgmr.msra.gmra.mrb[0].mxu0 %vm22_vm0, %v53_v25 }
 0x210   :  { %v151_v33 = vpop.f32.mrb[0].mxu0 }
 0x211   :  { %v152_v34 = vadd.f32 %v151_v33, %v67_v31  ;;  %v153_v35 = vpop.f32.mrb[1].mxu0 }
 0x212   :  { %v154_v36 = vadd.f32 %v153_v35, %v71_v32  ;;  %v155_v37 = vpop.f32.mrb[2].mxu0 }
 0x213   :  { %v156_v38 = vpop.f32.mrb[3].mxu0 }
 0x214   :  { %v186_v39 = vpack.c.bf16 %v154_v36, %v152_v34 }
 0x216   :  { %169 = vst.msk [vmem:[%s280_s5] sm:$0xff] %vm168_vm3, %v186_v39 }

// kernel: vit_gs_encoder_forward.12
= control target key start
LH: loop header
LB: loop body
LE: loop exit
PB: predicated region body
PF: predicated region fallthrough
CT: control target
= control target key end

     0   :  { %s1108_s15 = smov 0   ;;  %s1110_s16 = smov 0   ;;  %s1268_s0 = inlined_call_operand.vmem [shape: f32[2,4,576], index: 0, kind: input, shape index: {}]   ;;  %s1269_s1 = inlined_call_operand.vmem [shape: bf16[576,64], index: 1, kind: input, shape index: {}]   ;;  %s1270_s2 = inlined_call_operand.vmem [shape: f32[1,64], index: 2, kind: input, shape index: {}]   ;;  %s1271_s3 = inlined_call_operand.vmem [shape: f32[4,64], index: 3, kind: input, shape index: {}]   ;;  %s1272_s4 = inlined_call_operand.vmem [shape: f32[2,4,64], index: 4, kind: output, shape index: {}]  }
   0x1   :  { %s1112_s17 = smov 0  }
   0x2 LB: > { %s33_s18 = sadd.s32 1, %s1075_s16  ;;  %p888_p0 = scmp.ge.s32.totalorder %s1079_s17, 1  ;;  %s1079_s17 = sphi %s1112_s17, %s14_s17   ;;  %s1075_s16 = sphi %s1110_s16, %s1274_s16   ;;  %s1071_s15 = sphi %s1108_s15, %s1273_s15  }
   0x3   : > { %p35_p1 = scmp.ge.s32.totalorder %s33_s18, 2  ;;  %p222_p2 = scmp.lt.s32.totalorder %s1079_s17, 3 }
   0x5   : > { %s1276_s18 = smov (%p35_p1, %s33_s18), 0  ;;  %p223_p3 = pnand %p888_p0, %p222_p2 }
   0x6   : > { %v1019_v0 = vld [vmem:[%s1269_s1 + $0x40] sm:$0xff] (!%p223_p3)   ;;  %v1023_v4 = vld [vmem:[%s1269_s1 + $0x48] sm:$0xff] (!%p223_p3)   ;;  %v1027_v8 = vld [vmem:[%s1269_s1 + $0x50] sm:$0xff] (!%p223_p3)   ;;  %p271_p4 = scmp.lt.s32.totalorder (!%p223_p3), %s1071_s15, 1  ;;  %v1081_v34 = vmov (!%p223_p3), 0.0   ;;  %vm1082_vm0 = vmmov (!%p223_p3), 0  }
   0x7   : > { %226 = sbr.rel (%p223_p3) target bundleno = 272 (0x110), region = 36  ;;  %v1020_v1 = vld [vmem:[%s1269_s1] sm:$0xff] (!%p223_p3)   ;;  %931 = vmatprep.subr.bf16.mxu0 (!%p223_p3), %v1019_v0  ;;  %v1024_v5 = vld [vmem:[%s1269_s1 + $0x8] sm:$0xff] (!%p223_p3)   ;;  %v1028_v9 = vld [vmem:[%s1269_s1 + $0x10] sm:$0xff] (!%p223_p3)   ;;  %vm614_vm1 = vcmask (!%p223_p3), 523264   ;;  %vm740_vm2 = vcmask (!%p223_p3), 519168  }
   0x8   : > { %v1021_v2 = vld [vmem:[%s1269_s1 + $0xc0] sm:$0xff] (!%p223_p3)   ;;  %932 = vmatpush3.bf16.msra.mxu0 (!%p223_p3), %v1020_v1  ;;  %v1025_v6 = vld [vmem:[%s1269_s1 + $0xc8] sm:$0xff] (!%p223_p3)   ;;  %v1029_v10 = vld [vmem:[%s1269_s1 + $0xd0] sm:$0xff] (!%p223_p3)  }
   0x9   : > { %v1022_v3 = vld [vmem:[%s1269_s1 + $0x80] sm:$0xff] (!%p223_p3)   ;;  %953 = vmatprep.subr.bf16.mxu1 (!%p223_p3), %v1021_v2  ;;  %933 = vmatprep.subr.bf16.mxu0 (!%p223_p3), %v1023_v4  ;;  %v1026_v7 = vld [vmem:[%s1269_s1 + $0x88] sm:$0xff] (!%p223_p3)   ;;  %v1030_v11 = vld [vmem:[%s1269_s1 + $0x90] sm:$0xff] (!%p223_p3)  }
   0xa   : > { %954 = vmatpush3.bf16.msra.mxu1 (!%p223_p3), %v1022_v3  ;;  %v1031_v12 = vld [vmem:[%s1269_s1 + $0x58] sm:$0xff] (!%p223_p3)   ;;  %v1035_v16 = vld [vmem:[%s1269_s1 + $0x60] sm:$0xff] (!%p223_p3)   ;;  %v1039_v20 = vld [vmem:[%s1269_s1 + $0x68] sm:$0xff] (!%p223_p3)  }
   0xb   : > { %955 = vmatprep.subr.bf16.mxu1 (!%p223_p3), %v1025_v6  ;;  %v1032_v13 = vld [vmem:[%s1269_s1 + $0x18] sm:$0xff] (!%p223_p3)   ;;  %v1036_v17 = vld [vmem:[%s1269_s1 + $0x20] sm:$0xff] (!%p223_p3)   ;;  %v1040_v21 = vld [vmem:[%s1269_s1 + $0x28] sm:$0xff] (!%p223_p3)  }
   0xc   : > { %934 = vmatpush3.bf16.msra.mxu0 (!%p223_p3), %v1024_v5  ;;  %v1033_v14 = vld [vmem:[%s1269_s1 + $0xd8] sm:$0xff] (!%p223_p3)   ;;  %v1037_v18 = vld [vmem:[%s1269_s1 + $0xe0] sm:$0xff] (!%p223_p3)   ;;  %v1041_v22 = vld [vmem:[%s1269_s1 + $0xe8] sm:$0xff] (!%p223_p3)  }
   0xd   : > { %935 = vmatprep.subr.bf16.mxu0 (!%p223_p3), %v1027_v8  ;;  %v1034_v15 = vld [vmem:[%s1269_s1 + $0x98] sm:$0xff] (!%p223_p3)   ;;  %v1038_v19 = vld [vmem:[%s1269_s1 + $0xa0] sm:$0xff] (!%p223_p3)   ;;  %v1042_v23 = vld [vmem:[%s1269_s1 + $0xa8] sm:$0xff] (!%p223_p3)  }
   0xe   : > { %956 = vmatpush3.bf16.msra.mxu1 %v1026_v7  ;;  %s1278_s15 = smov (!%p271_p4, %s1071_s15), 1  ;;  %v1043_v24 = vld [vmem:[%s1269_s1 + $0x70] sm:$0xff]   ;;  %v1047_v28 = vld [vmem:[%s1269_s1 + $0x78] sm:$0xff]   ;;  %v1053_v40 = vld [vmem:[%s1269_s1 + $0x100] sm:$0xff]  }
   0xf   : > { %957 = vmatprep.subr.bf16.mxu1 %v1029_v10  ;;  %s992_s25 = smul.u32 20, %s1278_s15  ;;  %v1044_v25 = vld [vmem:[%s1269_s1 + $0x30] sm:$0xff]   ;;  %v1048_v29 = vld [vmem:[%s1269_s1 + $0x38] sm:$0xff]   ;;  %v1054_v42 = vld [vmem:[%s1269_s1 + $0x108] sm:$0xff]   ;;  %s890_s5 = sshll.u32 %s1278_s15, 2 }
  0x10   : > { %936 = vmatpush3.bf16.msra.mxu0 %v1028_v9  ;;  %v1045_v26 = vld [vmem:[%s1269_s1 + $0xf0] sm:$0xff]   ;;  %v1049_v30 = vld [vmem:[%s1269_s1 + $0xf8] sm:$0xff]   ;;  %v891_v48 = vld [vmem:[%s1270_s2] ss:$0 sm:$0xff] }
  0x11   : > { %937 = vmatprep.subr.bf16.mxu0 %v1031_v12  ;;  %v1046_v27 = vld [vmem:[%s1269_s1 + $0xb0] sm:$0xff]   ;;  %s1223_s10 = scalar_lea.vmem %s1268_s0, %s992_s25  ;;  %v1051_v33 = vld [vmem:[%s1269_s1 + $0xb8] sm:$0xff]   ;;  %v738_v61 = vld [vmem:[%s1271_s3] sm:$0xf] }
  0x12   : > { %958 = vmatpush3.bf16.msra.mxu1 %v1030_v11  ;;  %v305_v31 = vld [vmem:[%s1223_s10] sm:$0xff]  ;;  %v306_v35 = vld [vmem:[%s1223_s10 + $0x8] sm:$0xff]  ;;  %v1055_v43 = vld [vmem:[%s1269_s1 + $0x110] sm:$0xff]  }
  0x13   : > { %959 = vmatprep.subr.bf16.mxu1 %v1033_v14  ;;  %v310_v32 = vcombine.high %v305_v31, %v305_v31  ;;  %v314_v36 = vpack.c.bf16 %v305_v31, %v305_v31  ;;  %v311_v37 = vcombine.high %v306_v35, %v306_v35  ;;  %v316_v39 = vpack.c.bf16 %v306_v35, %v306_v35  ;;  %v307_v44 = vld [vmem:[%s1223_s10 + $0x10] sm:$0xf]  ;;  %v1056_v45 = vld [vmem:[%s1269_s1 + $0x118] sm:$0xff]   ;;  %s303_s10 = scalar_lea.vmem %s1272_s4, %s890_s5 }
  0x14   : > { %938 = vmatpush3.bf16.msra.mxu0 %v1032_v13  ;;  %v318_v46 = vpack.c.bf16 %v307_v44, %v307_v44 }
  0x15   : > { %939 = vmatprep.subr.bf16.mxu0 %v1035_v16  ;;  %v315_v38 = vpack.c.bf16 %v310_v32, %v310_v32  ;;  %v317_v41 = vpack.c.bf16 %v311_v37, %v311_v37 }
  0x16   : > { %960 = vmatpush3.bf16.msra.mxu1 %v1034_v15 }
  0x17   : > { %961 = vmatprep.subr.bf16.mxu1 %v1037_v18  ;;  %650 = vmatprep.mubr.bf16.mxu0 %v315_v38 }
  0x18   : > { %940 = vmatpush3.bf16.msra.mxu0 %v1036_v17  ;;  %690 = vmatprep.mubr.bf16.mxu1 %v317_v41 }
  0x19   : > { %941 = vmatprep.subr.bf16.mxu0 %v1039_v20 }
  0x1a   : > { %962 = vmatpush3.bf16.msra.mxu1 %v1038_v19 }
  0x1b   : > { %963 = vmatprep.subr.bf16.mxu1 %v1041_v22 }
  0x1c   : > { %942 = vmatpush3.bf16.msra.mxu0 %v1040_v21 }
  0x1d   : > { %943 = vmatprep.subr.bf16.mxu0 %v1043_v24 }
  0x1e   : > { %964 = vmatpush3.bf16.msra.mxu1 %v1042_v23 }
  0x1f   : > { %965 = vmatprep.subr.bf16.mxu1 %v1045_v26 }
  0x20   : > { %944 = vmatpush3.bf16.msra.mxu0 %v1044_v25 }
  0x21   : > { %945 = vmatprep.subr.bf16.mxu0 %v1047_v28 }
  0x22   : > { %966 = vmatpush3.bf16.msra.mxu1 %v1046_v27 }
  0x23   : > { %967 = vmatprep.subr.bf16.mxu1 %v1049_v30 }
  0x24   : > { %946 = vmatpush3.bf16.msra.mxu0 %v1048_v29 }
  0x25   : > { %980 = vmatprep.subr.bf16.mxu0 %v1081_v34 }
  0x26   : > { %968 = vmatpush3.bf16.msra.mxu1 %v1051_v33 }
  0x27   : > { %651 = vmatmul.mubr.bf16.vlgmr.msra.gmra.mrb[0].mxu0 %v314_v36 }
  0x28   : > { %981 = vmatpush3.bf16.msra.mxu0 %v1053_v40  ;;  %988 = vmatprep.mubr.msk.bf16.mxu0 %vm1082_vm0, %v1081_v34 }
  0x29   : > { %691 = vmatmul.mubr.bf16.vlgmr.msra.gmra.mrb[0].mxu1 %v316_v39  ;;  %982 = vmatprep.subr.bf16.mxu0 %v1081_v34 }
  0x2c   : > { %983 = vmatpush3.bf16.msra.mxu0 %v1054_v42 }
  0x2d   : > { %984 = vmatprep.subr.bf16.mxu0 %v1081_v34 }
  0x30   : > { %985 = vmatpush3.bf16.msra.mxu0 %v1055_v43 }
  0x31   : > { %986 = vmatprep.subr.bf16.mxu0 %v1081_v34 }
  0x34   : > { %987 = vmatpush3.bf16.msra.mxu0 %v1056_v45 }
  0x37   : > { %989 = vmatmul.mubr.msk.bf16.vlgmr.msra.gmra.mrb[4].mxu0 %vm614_vm1, %v318_v46 }
  0xfa   : > { %v947_v47 = vpop.f32.mrb[0].mxu0 }
  0xfb   : > { %v948_v49 = vpop.f32.mrb[1].mxu0 }
  0xfc   : > { %v969_v50 = vpop.f32.mrb[0].mxu1  ;;  %v949_v51 = vadd.f32 %v948_v49, %v947_v47  ;;  %v950_v52 = vpop.f32.mrb[2].mxu0 }
  0xfd   : > { %v970_v53 = vpop.f32.mrb[1].mxu1  ;;  %v951_v54 = vpop.f32.mrb[3].mxu0 }
  0xfe   : > { %v971_v55 = vadd.f32 %v970_v53, %v969_v50  ;;  %v972_v56 = vpop.f32.mrb[2].mxu1  ;;  %v653_v57 = vadd.f32 %v949_v51, %v891_v48 }
  0xff   : > { %v973_v58 = vpop.f32.mrb[3].mxu1 }
 0x100   : > { %v693_v59 = vadd.f32 %v971_v55, %v653_v57 }
 0x10a   : > { %v732_v60 = vpop.f32.mrb[4].mxu0 }
 0x10b   : > { %v733_v62 = vadd.f32 %v732_v60, %v693_v59  ;;  %v990_v63 = vpop.f32.mrb[5].mxu0 }
 0x10c   : > { %v735_v0 = vpop.f32.mrb[6].mxu0 }
 0x10d   : > { %v739_v1 = vadd.f32 %v738_v61, %v733_v62  ;;  %v991_v2 = vpop.f32.mrb[7].mxu0 }
 0x10f   : > { %741 = vst.msk [vmem:[%s303_s10] sm:$0xf] %vm740_vm2, %v739_v1 }
 0x110 PF: > { %s14_s17 = sadd.s32 1, %s1079_s17   ;;  %s1273_s15 = smov %s1075_s16 }
 0x111   : > { %p11_p5 = scmp.ge.s32.totalorder %s14_s17, 4   ;;  %s1274_s16 = smov %s1276_s18 }
 0x113   :  { %13 = sbr.rel (!%p11_p5) target bundleno = 2 (0x2), region = 75 }

// kernel: vit_gs_encoder_forward.14
= control target key start
LH: loop header
LB: loop body
LE: loop exit
PB: predicated region body
PF: predicated region fallthrough
CT: control target
= control target key end

     0   :  { %s600_s15 = smov 0   ;;  %s646_s0 = inlined_call_operand.vmem [shape: bf16[2,4,192], index: 0, kind: input, shape index: {}]   ;;  %s647_s1 = inlined_call_operand.vmem [shape: bf16[64,64], index: 1, kind: input, shape index: {}]   ;;  %s648_s2 = inlined_call_operand.vmem [shape: f32[1,64], index: 2, kind: input, shape index: {}]   ;;  %s649_s3 = inlined_call_operand.vmem [shape: f32[2,4,64], index: 3, kind: input, shape index: {}]   ;;  %s650_s4 = inlined_call_operand.vmem [shape: f32[2,4,64], index: 4, kind: output, shape index: {}]  }
   0x1 LB: > { %s490_s16 = sadd.s32 4294967295, %s569_s15   ;;  %p494_p0 = scmp.ge.s32.totalorder %s569_s15, 1  ;;  %s569_s15 = sphi %s600_s15, %s14_s15  }
   0x2   : > { %p171_p1 = scmp.lt.s32.totalorder %s569_s15, 3 }
   0x4   : > { %p172_p2 = pnand %p494_p0, %p171_p1 }
   0x5   : > { %p200_p3 = scmp.lt.s32.totalorder (!%p172_p2), %s490_s16, 1  ;;  %v219_v0 = vlaneseq (!%p172_p2)  ;;  %v571_v1 = vmov (!%p172_p2), 1983009808   ;;  %v572_v3 = vmov (!%p172_p2), 0.0   ;;  %vm573_vm0 = vmmov (!%p172_p2), 0   ;;  %s574_s21 = smov (!%p172_p2), 64  }
   0x6   : > { %175 = sbr.rel (%p172_p2) target bundleno = 1111 (0x457), region = 36  ;;  %v217_v2 = vunpack.c.l.s4 (!%p172_p2), %v571_v1  ;;  %519 = vmatprep.subr.bf16.mxu0 (!%p172_p2), %v572_v3  ;;  %531 = vmatprep.subr.bf16.mxu1 (!%p172_p2), %v572_v3  ;;  %vm225_vm1 = vcmask (!%p172_p2), 523264   ;;  %vm273_vm2 = vcmask (!%p172_p2), 27648   ;;  %vm291_vm3 = vcmask (!%p172_p2), 1041408   ;;  %v555_v24 = vld [vmem:[%s647_s1] sm:$0xff] (!%p172_p2)   ;;  %v556_v29 = vld [vmem:[%s647_s1 + $0x8] sm:$0xff] (!%p172_p2)  }
   0x7   : > { %v220_v4 = vshrl.u32 (!%p172_p2), %v219_v0, 7  ;;  %521 = vmatprep.mubr.msk.bf16.mxu0 (!%p172_p2), %vm573_vm0, %v572_v3  ;;  %539 = vmatprep.mubr.msk.bf16.mxu1 (!%p172_p2), %vm573_vm0, %v572_v3  ;;  %vm287_vm4 = vcmask (!%p172_p2), 31744   ;;  %v557_v30 = vld [vmem:[%s647_s1 + $0x10] sm:$0xff] (!%p172_p2)   ;;  %v558_v31 = vld [vmem:[%s647_s1 + $0x18] sm:$0xff] (!%p172_p2)   ;;  %vm336_vm5 = vcmask (!%p172_p2), 517120   ;;  %vm423_vm6 = vcmask (!%p172_p2), 519168  }
   0x8   : > { %v218_v5 = vunpack.c.0.s8 (!%p172_p2), %v217_v2  ;;  %532 = vmatpush3.bf16.msra.mxu1 (!%p172_p2), %v555_v24  ;;  %v501_v38 = vld [vmem:[%s648_s2] ss:$0 sm:$0xff] (!%p172_p2) }
   0x9   : > { %533 = vmatprep.subr.bf16.mxu1 (!%p172_p2), %v572_v3 }
   0xa   : > { %v221_v6 = vsub.s32 (!%p172_p2), %v218_v5, %v220_v4 }
   0xc   : > { %534 = vmatpush3.bf16.msra.mxu1 (!%p172_p2), %v556_v29 }
   0xd   : > { %s652_s16 = smov (!%p200_p3, %s490_s16), 1  ;;  %535 = vmatprep.subr.bf16.mxu1 %v572_v3 }
   0xe   : > { %s610_s17 = sshll.u32 %s652_s16, 2 }
   0xf   : > { %s204_s20 = scalar_lea.vmem %s646_s0, %s610_s17  ;;  %s208_s6 = scalar_lea.vmem %s649_s3, %s610_s17 }
  0x10   : > { %v214_v7 = vld [vmem:[%s204_s20] sm:$0xf]  ;;  %536 = vmatpush3.bf16.msra.mxu1 %v557_v30  ;;  %s212_s11 = scalar_lea.vmem %s650_s4, %s610_s17 }
  0x11   : > { %v222_v8 = vrot.slane %v214_v7, %v221_v6  ;;  %537 = vmatprep.subr.bf16.mxu1 %v572_v3  ;;  %v421_v40 = vld [vmem:[%s208_s6] sm:$0xf] }
  0x13   : > { %223 = vrot.lane.b32.xlu0 %v222_v8, %s574_s21  ;;  %v286_v22 = vcombine.high %v222_v8, %v222_v8 }
  0x14   : > { %538 = vmatpush3.bf16.msra.mxu1 %v558_v31 }
  0x15   : > { %v293_v23 = vsel %vm291_vm3, %v286_v22, 0 }
  0x85   : > { %v224_v9 = vpop.permute.xlu0 %223 }
  0x86   : > { %v230_v10 = vsel %vm225_vm1, %v224_v9, 0 }
  0x87   : > { %520 = vmatpush3.bf16.xpose.msra.mxu0 %v230_v10 }
  0x88   : > { %525 = vmatprep.subr.bf16.mxu0 %v572_v3 }
  0x8e   : > { %522 = vmatmul.mubr.msk.bf16.vlgmr.msra.gmra.mrb[0].mxu0 %vm225_vm1, %v214_v7 }
  0x8f   : > { %527 = vmatprep.mubr.msk.bf16.mxu0 %vm573_vm0, %v572_v3  ;;  %526 = vmatpush3.bf16.msra.mxu0 %v293_v23 }
 0x161   : > { %v266_v11 = vpop.f32.mrb[0].mxu0 }
 0x162   : > { %v272_v12 = vmul.f32 0.125, %v266_v11  ;;  %v523_v13 = vpop.f32.mrb[1].mxu0 }
 0x163   : > { %v269_v14 = vpop.f32.mrb[2].mxu0 }
 0x164   : > { %v524_v15 = vpop.f32.mrb[3].mxu0  ;;  %v274_v16 = vsel %vm273_vm2, %v272_v12, -inf }
 0x165   : > { %275 = vmax.xlane.f32.xlu0 %v274_v16 }
 0x1f2   : > { %v276_v17 = vpop.xlane.xlu0 %275 }
 0x1f3   : > { %v277_v18 = vsub.f32 %v272_v12, %v276_v17 }
 0x1f5   : > { %v278_v19 = vmul.f32 1.442695, %v277_v18 }
 0x1f7   : > { %559 = vpow2.f32 %v278_v19 }
 0x201   : > { %v560_v20 = vpop.eup %559 }
 0x202   : > { %v280_v21 = vsel %vm273_vm2, %v560_v20, 0.0 }
 0x203   : > { %281 = vadd.xlane.f32.xlu1 %v280_v21 }
 0x290   : > { %v282_v25 = vpop.xlane.xlu1 %281 }
 0x291   : > { %561 = vrcp.f32 %v282_v25 }
 0x29b   : > { %v562_v26 = vpop.eup %561 }
 0x29c   : > { %v284_v27 = vmul.f32 %v562_v26, %v560_v20 }
 0x29e   : > { %v285_v28 = vpack.c.bf16 %v284_v27, %v284_v27 }
 0x2a0   : > { %528 = vmatmul.mubr.msk.bf16.vlgmr.msra.gmra.mrb[4].mxu0 %vm287_vm4, %v285_v28 }
 0x373   : > { %v329_v32 = vpop.f32.mrb[4].mxu0 }
 0x374   : > { %v335_v33 = vpack.c.bf16 %v329_v32, %v329_v32  ;;  %v529_v34 = vpop.f32.mrb[5].mxu0 }
 0x375   : > { %v332_v35 = vpop.f32.mrb[6].mxu0 }
 0x376   : > { %337 = vst.msk [vmem:[#allocation2] sm:$0x3] %vm336_vm5, %v335_v33  ;;  %v530_v36 = vpop.f32.mrb[7].mxu0 }
 0x37d   : > { %v338_v37 = vld [vmem:[#allocation2] sm:$0x3] }
 0x37e   : > { %540 = vmatmul.mubr.msk.bf16.vlgmr.msra.gmra.mrb[0].mxu1 %vm225_vm1, %v338_v37 }
 0x451   : > { %v415_v39 = vpop.f32.mrb[0].mxu1 }
 0x452   : > { %v416_v41 = vadd.f32 %v501_v38, %v415_v39  ;;  %v541_v42 = vpop.f32.mrb[1].mxu1 }
 0x453   : > { %v418_v43 = vpop.f32.mrb[2].mxu1 }
 0x454   : > { %v422_v44 = vadd.f32 %v421_v40, %v416_v41  ;;  %v542_v45 = vpop.f32.mrb[3].mxu1 }
 0x456   : > { %424 = vst.msk [vmem:[%s212_s11] sm:$0xf] %vm423_vm6, %v422_v44 }
 0x457 PF: > { %s14_s15 = sadd.s32 1, %s569_s15  }
 0x458   : > { %p11_p4 = scmp.ge.s32.totalorder %s14_s15, 4  }
 0x45a   :  { %13 = sbr.rel (!%p11_p4) target bundleno = 1 (0x1), region = 69 }

// kernel: vit_gs_encoder_forward.19
= control target key start
LH: loop header
LB: loop body
LE: loop exit
PB: predicated region body
PF: predicated region fallthrough
CT: control target
= control target key end

     0   :  { %vm15_vm0 = vcmask 523264   ;;  %s90_s0 = inlined_call_operand.vmem [shape: f32[8,64], index: 0, kind: input, shape index: {}]   ;;  %s91_s1 = inlined_call_operand.vmem [shape: f32[1,64], index: 1, kind: input, shape index: {}]   ;;  %s92_s2 = inlined_call_operand.vmem [shape: f32[1,64], index: 2, kind: input, shape index: {}]   ;;  %s93_s3 = inlined_call_operand.vmem [shape: f32[8,64], index: 3, kind: output, shape index: {}]  }
   0x1   :  { %v14_v0 = vld [vmem:[%s90_s0] sm:$0xff] }
   0x2   :  { %v16_v1 = vsel %vm15_vm0, %v14_v0, 0.0  ;;  %v51_v11 = vld [vmem:[%s91_s1] ss:$0 sm:$0xff] }
   0x3   :  { %17 = vadd.xlane.f32.xlu0 %v16_v1  ;;  %v52_v13 = vld [vmem:[%s92_s2] ss:$0 sm:$0xff] }
  0x90   :  { %v18_v2 = vpop.xlane.xlu0 %17 }
  0x91   :  { %v20_v3 = vmul.f32 0.015625, %v18_v2 }
  0x93   :  { %v21_v4 = vsub.f32 %v14_v0, %v20_v3 }
  0x95   :  { %v22_v5 = vmul.f32 %v21_v4, %v21_v4 }
  0x97   :  { %v23_v6 = vsel %vm15_vm0, %v22_v5, 0.0 }
  0x98   :  { %24 = vadd.xlane.f32.xlu0 %v23_v6 }
 0x125   :  { %v25_v7 = vpop.xlane.xlu0 %24 }
 0x126   :  { %v26_v8 = vmul.f32 0.015625, %v25_v7 }
 0x128   :  { %v27_v9 = vadd.f32 1e-05, %v26_v8 }
 0x12a   :  { %53 = vrsqrt.f32 %v27_v9 }
 0x134   :  { %v54_v10 = vpop.eup %53 }
 0x135   :  { %v29_v12 = vmul.f32 %v54_v10, %v21_v4 }
 0x137   :  { %v37_v14 = vmul.f32 %v51_v11, %v29_v12 }
 0x139   :  { %v45_v15 = vadd.f32 %v52_v13, %v37_v14 }
 0x13b   :  { %46 = vst.msk [vmem:[%s93_s3] sm:$0xff] %vm15_vm0, %v45_v15 }

// kernel: vit_gs_encoder_forward.15
= control target key start
LH: loop header
LB: loop body
LE: loop exit
PB: predicated region body
PF: predicated region fallthrough
CT: control target
= control target key end

     0   :  { %vm32_vm0 = vcmask 523264   ;;  %v469_v15 = vmov 0   ;;  %vm64_vm1 = vcmask 519168   ;;  %v78_v43 = vlaneseq  ;;  %s612_s0 = inlined_call_operand.vmem [shape: f32[8,64], index: 0, kind: input, shape index: {}]   ;;  %s613_s3 = inlined_call_operand.vmem [shape: bf16[64,256], index: 3, kind: input, shape index: {}]   ;;  %s614_s1 = inlined_call_operand.vmem [shape: f32[1,64], index: 1, kind: input, shape index: {}]   ;;  %s615_s2 = inlined_call_operand.vmem [shape: f32[1,64], index: 2, kind: input, shape index: {}]   ;;  %s616_s5 = inlined_call_operand.vmem [shape: bf16[256,64], index: 5, kind: input, shape index: {}]   ;;  %s617_s4 = inlined_call_operand.vmem [shape: f32[1,256], index: 4, kind: input, shape index: {}]   ;;  %s618_s6 = inlined_call_operand.vmem [shape: f32[1,64], index: 6, kind: input, shape index: {}]   ;;  %s619_s7 = inlined_call_operand.vmem [shape: f32[8,64], index: 7, kind: output, shape index: {}]  }
   0x1   :  { %v514_v0 = vld [vmem:[%s612_s0] sm:$0xff]  ;;  %v438_v9 = vld [vmem:[%s613_s3 + $0x14] ss:$8 sps:$4 sm:$0xff]   ;;  %v440_v10 = vld [vmem:[%s613_s3 + $0x10] ss:$8 sps:$4 sm:$0xff]   ;;  %164 = vmatprep.mubr.bf16.mxu0 %v469_v15 }
   0x2   :  { %v33_v1 = vsel %vm32_vm0, %v514_v0, 0.0  ;;  %v435_v7 = vld [vmem:[%s613_s3 + $0x4] ss:$8 sps:$4 sm:$0xff]   ;;  %v437_v8 = vld [vmem:[%s613_s3] ss:$8 sps:$4 sm:$0xff]   ;;  %v451_v31 = vld [vmem:[%s616_s5 + $0x50] sm:$0xff]  }
   0x3   :  { %34 = vadd.xlane.f32.xlu0 %v33_v1  ;;  %132 = vmatprep.subr.bf16.mxu0 %v435_v7  ;;  %v441_v11 = vld [vmem:[%s613_s3 + $0x24] ss:$8 sps:$4 sm:$0xff]   ;;  %v443_v12 = vld [vmem:[%s613_s3 + $0x20] ss:$8 sps:$4 sm:$0xff]   ;;  %v444_v13 = vld [vmem:[%s613_s3 + $0x34] ss:$8 sps:$4 sm:$0xff]  }
   0x4   :  { %133 = vmatpush1.bf16.msra.mxu0 %v437_v8  ;;  %v446_v14 = vld [vmem:[%s613_s3 + $0x30] ss:$8 sps:$4 sm:$0xff]   ;;  %v383_v20 = vld [vmem:[%s614_s1] ss:$0 sm:$0xff]  ;;  %v449_v29 = vld [vmem:[%s616_s5 + $0x48] sm:$0xff]   ;;  %v79_v44 = vshrl.u32 %v78_v43, 7 }
   0x5   :  { %134 = vmatprep.subr.bf16.mxu0 %v438_v9  ;;  %v384_v22 = vld [vmem:[%s615_s2] ss:$0 sm:$0xff]  ;;  %v450_v30 = vld [vmem:[%s616_s5 + $0x8] sm:$0xff]   ;;  %v452_v32 = vld [vmem:[%s616_s5 + $0x10] sm:$0xff]  }
   0x6   :  { %v447_v27 = vld [vmem:[%s616_s5 + $0x40] sm:$0xff]   ;;  %v453_v33 = vld [vmem:[%s616_s5 + $0x58] sm:$0xff]   ;;  %v457_v37 = vld [vmem:[%s616_s5 + $0x68] sm:$0xff]   ;;  %v80_v45 = vsub.s32 0, %v79_v44  ;;  %v84_v47 = vsub.s32 1, %v79_v44 }
   0x7   :  { %v448_v28 = vld [vmem:[%s616_s5] sm:$0xff]   ;;  %411 = vmatprep.subr.bf16.mxu1 %v447_v27  ;;  %v454_v34 = vld [vmem:[%s616_s5 + $0x18] sm:$0xff]   ;;  %v458_v38 = vld [vmem:[%s616_s5 + $0x28] sm:$0xff]  }
   0x8   :  { %135 = vmatpush1.bf16.msra.mxu0 %v440_v10  ;;  %412 = vmatpush3.bf16.msra.mxu1 %v448_v28  ;;  %v455_v35 = vld [vmem:[%s616_s5 + $0x60] sm:$0xff]   ;;  %v459_v39 = vld [vmem:[%s616_s5 + $0x70] sm:$0xff]   ;;  %v461_v41 = vld [vmem:[%s616_s5 + $0x78] sm:$0xff]  }
   0x9   :  { %136 = vmatprep.subr.bf16.mxu0 %v441_v11  ;;  %413 = vmatprep.subr.bf16.mxu1 %v449_v29  ;;  %v456_v36 = vld [vmem:[%s616_s5 + $0x20] sm:$0xff]   ;;  %v460_v40 = vld [vmem:[%s616_s5 + $0x30] sm:$0xff]   ;;  %v462_v42 = vld [vmem:[%s616_s5 + $0x38] sm:$0xff]  }
   0xa   :  { %v76_v46 = vld [vmem:[%s617_s4] sm:$0x3] }
   0xb   :  { %v81_v48 = vrot.slane %v76_v46, %v80_v45  ;;  %v85_v49 = vrot.slane %v76_v46, %v84_v47 }
   0xc   :  { %137 = vmatpush1.bf16.msra.mxu0 %v443_v12  ;;  %414 = vmatpush3.bf16.msra.mxu1 %v450_v30 }
   0xd   :  { %138 = vmatprep.subr.bf16.mxu0 %v444_v13  ;;  %415 = vmatprep.subr.bf16.mxu1 %v451_v31  ;;  %v470_v13 = vmov 0.0  }
   0xe   :  { %66 = vst.msk [vmem:[#allocation2] sm:$0xff] %vm32_vm0, %v470_v13 }
  0x10   :  { %139 = vmatpush1.bf16.msra.mxu0 %v446_v14  ;;  %416 = vmatpush3.bf16.msra.mxu1 %v452_v32 }
  0x11   :  { %417 = vmatprep.subr.bf16.mxu1 %v453_v33 }
  0x14   :  { %418 = vmatpush3.bf16.msra.mxu1 %v454_v34 }
  0x15   :  { %419 = vmatprep.subr.bf16.mxu1 %v455_v35  ;;  %v191_v15 = vld [vmem:[#allocation2] sm:$0xff] }
  0x18   :  { %420 = vmatpush3.bf16.msra.mxu1 %v456_v36 }
  0x19   :  { %421 = vmatprep.subr.bf16.mxu1 %v457_v37 }
  0x1c   :  { %422 = vmatpush3.bf16.msra.mxu1 %v458_v38 }
  0x1d   :  { %423 = vmatprep.subr.bf16.mxu1 %v459_v39 }
  0x20   :  { %424 = vmatpush3.bf16.msra.mxu1 %v460_v40 }
  0x21   :  { %425 = vmatprep.subr.bf16.mxu1 %v461_v41 }
  0x24   :  { %426 = vmatpush3.bf16.msra.mxu1 %v462_v42 }
  0x90   :  { %v35_v2 = vpop.xlane.xlu0 %34 }
  0x91   :  { %v37_v3 = vmul.f32 0.015625, %v35_v2 }
  0x93   :  { %v38_v4 = vsub.f32 %v514_v0, %v37_v3 }
  0x95   :  { %v39_v5 = vmul.f32 %v38_v4, %v38_v4 }
  0x97   :  { %v40_v6 = vsel %vm32_vm0, %v39_v5, 0.0 }
  0x98   :  { %41 = vadd.xlane.f32.xlu0 %v40_v6 }
 0x125   :  { %v42_v16 = vpop.xlane.xlu0 %41 }
 0x126   :  { %v43_v17 = vmul.f32 0.015625, %v42_v16 }
 0x128   :  { %v44_v18 = vadd.f32 1e-05, %v43_v17 }
 0x12a   :  { %463 = vrsqrt.f32 %v44_v18 }
 0x134   :  { %v464_v19 = vpop.eup %463 }
 0x135   :  { %v46_v21 = vmul.f32 %v464_v19, %v38_v4 }
 0x137   :  { %v54_v23 = vmul.f32 %v383_v20, %v46_v21  ;;  %v410_v21 = vld [vmem:[%s618_s6] ss:$0 sm:$0xff] }
 0x139   :  { %v62_v24 = vadd.f32 %v384_v22, %v54_v23 }
 0x13b   :  { %v63_v25 = vpack.c.bf16 %v62_v24, %v62_v24 }
 0x13d   :  { %65 = vst.msk [vmem:[#allocation3] sm:$0xf] %vm64_vm1, %v63_v25 }
 0x144   :  { %v67_v26 = vld [vmem:[#allocation3] sm:$0xf] }
 0x145   :  { %393 = vmatmul.mubr.msk.bf16.vlgmr.msra.gmra.mrb[0].mxu0 %vm32_vm0, %v67_v26 }
 0x218   :  { %v166_v50 = vpop.f32.mrb[0].mxu0 }
 0x219   :  { %v167_v51 = vadd.f32 %v166_v50, %v81_v48  ;;  %v168_v52 = vpop.f32.mrb[1].mxu0 }
 0x21a   :  { %v169_v53 = vadd.f32 %v168_v52, %v85_v49  ;;  %v170_v54 = vpop.f32.mrb[2].mxu0 }
 0x21b   :  { %v173_v55 = vmul.f32 %v167_v51, %v167_v51  ;;  %v171_v56 = vpop.f32.mrb[3].mxu0 }
 0x21c   :  { %v174_v57 = vmul.f32 %v169_v53, %v169_v53 }
 0x21d   :  { %v175_v58 = vmul.f32 %v173_v55, %v167_v51 }
 0x21e   :  { %v176_v59 = vmul.f32 %v174_v57, %v169_v53 }
 0x21f   :  { %v177_v60 = vmul.f32 0.044715, %v175_v58 }
 0x220   :  { %v178_v61 = vmul.f32 0.044715, %v176_v59 }
 0x221   :  { %v179_v62 = vadd.f32 %v177_v60, %v167_v51 }
 0x222   :  { %v180_v63 = vadd.f32 %v178_v61, %v169_v53 }
 0x223   :  { %v181_v1 = vmul.f32 0.7978846, %v179_v62 }
 0x224   :  { %v182_v2 = vmul.f32 0.7978846, %v180_v63 }
 0x225   :  { %465 = vtanh.f32 %v181_v1 }
 0x226   :  { %467 = vtanh.f32 %v182_v2 }
 0x22f   :  { %v466_v3 = vpop.eup %465 }
 0x230   :  { %v468_v4 = vpop.eup %467  ;;  %v185_v5 = vadd.f32 1.0, %v466_v3 }
 0x231   :  { %v186_v6 = vadd.f32 1.0, %v468_v4 }
 0x232   :  { %v187_v7 = vmul.f32 0.5, %v185_v5 }
 0x233   :  { %v188_v8 = vmul.f32 0.5, %v186_v6 }
 0x234   :  { %v189_v9 = vmul.f32 %v187_v7, %v167_v51 }
 0x235   :  { %v190_v10 = vmul.f32 %v188_v8, %v169_v53 }
 0x236   :  { %v192_v12 = vpack.c.bf16 %v189_v9, %v189_v9 }
 0x237   :  { %v193_v11 = vpack.c.bf16 %v190_v10, %v190_v10 }
 0x239   :  { %354 = vmatprep.mubr.bf16.mxu1 %v193_v11 }
 0x23a   :  { %355 = vmatmul.mubr.bf16.vlgmr.msra.gmra.mrb[0].mxu1 %v192_v12 }
 0x30d   :  { %v427_v14 = vpop.f32.mrb[0].mxu1 }
 0x30e   :  { %v428_v16 = vpop.f32.mrb[1].mxu1 }
 0x30f   :  { %v429_v17 = vadd.f32 %v428_v16, %v427_v14  ;;  %v430_v18 = vpop.f32.mrb[2].mxu1 }
 0x310   :  { %v431_v19 = vpop.f32.mrb[3].mxu1 }
 0x311   :  { %v362_v20 = vadd.f32 %v429_v17, %v191_v15 }
 0x313   :  { %363 = vst.msk [vmem:[#allocation2] sm:$0xff] %vm32_vm0, %v362_v20 }
 0x31a   :  { %v367_v22 = vld [vmem:[#allocation2] sm:$0xff] }
 0x31b   :  { %v375_v23 = vadd.f32 %v410_v21, %v367_v22 }
 0x31d   :  { %v377_v24 = vadd.f32 %v375_v23, %v514_v0 }
 0x31f   :  { %378 = vst.msk [vmem:[%s619_s7] sm:$0xff] %vm32_vm0, %v377_v24 }

// kernel: vit_gs_encoder_forward.20
= control target key start
LH: loop header
LB: loop body
LE: loop exit
PB: predicated region body
PF: predicated region fallthrough
CT: control target
= control target key end

     0   :  { %s706_s12 = smov 0   ;;  %s708_s13 = smov 0   ;;  %s777_s0 = inlined_call_operand.vmem [shape: f32[8,64], index: 0, kind: input, shape index: {}]   ;;  %s778_s1 = inlined_call_operand.vmem [shape: bf16[64,768], index: 1, kind: input, shape index: {}]   ;;  %s779_s2 = inlined_call_operand.vmem [shape: f32[1,768], index: 2, kind: input, shape index: {}]   ;;  %s780_s3 = inlined_call_operand.vmem [shape: f32[8,768], index: 3, kind: output, shape index: {}]  }
   0x1   :  { %s710_s14 = smov 0   ;;  %s712_s15 = smov 0  }
   0x2   :  { %s714_s16 = smov 0  }
   0x3 LB: > { %s28_s17 = sadd.s32 1, %s679_s15  ;;  %p76_p1 = scmp.ne.s32.totalorder %s671_s13, %s667_s12  ;;  %s683_s16 = sphi %s714_s16, %s13_s16   ;;  %s679_s15 = sphi %s712_s15, %s784_s15   ;;  %s675_s14 = sphi %s710_s14, %s783_s14   ;;  %s671_s13 = sphi %s708_s13, %s782_s13   ;;  %s667_s12 = sphi %s706_s12, %s781_s12  }
   0x4   : > { %p30_p0 = scmp.ge.s32.totalorder %s28_s17, 3  ;;  %p77_p2 = scmp.eq.s32.totalorder %s683_s16, 0 }
   0x5   : > { %s69_s19 = sadd.s32 1, %s671_s13  ;;  %p571_p5 = scmp.ge.s32.totalorder %s683_s16, 3 }
   0x6   : > { %s786_s17 = smov (%p30_p0, %s28_s17), 0  ;;  %p78_p3 = por %p77_p2, %p76_p1 }
   0x7   : > { %s65_s18 = ssub.s32 %s679_s15, %s786_s17  ;;  %166 = sbr.rel (%p571_p5) target bundleno = 22 (0x16), region = 20 }
   0x8   : > { %p67_p4 = scmp.eq.s32.totalorder %s65_s18, 0 }
   0xa   : > { %s741_s20 = scalar_select %p67_p4, %s671_s13, %s69_s19  }
   0xe   : > { %169 = sbr.rel (!%p78_p3) target bundleno = 22 (0x16), region = 24  ;;  %s171_s21 = sand.u32 (%p78_p3), 1, %s671_s13  }
   0xf   : > { %s591_s22 = sshll.u32 (%p78_p3), %s679_s15, 3  ;;  %s572_s23 = sshll.u32 (%p78_p3), %s171_s21, 6 }
  0x10   : > { %s179_s26 = scalar_lea.vmem (%p78_p3), %s778_s1, %s591_s22  ;;  %s173_s27 = scalar_lea.vmem (%p78_p3), [#allocation3], %s572_s23 }
  0x11   : > { %v221_v0 = vld [vmem:[%s179_s26] sm:$0xff] (%p78_p3)  ;;  %v223_v1 = vld [vmem:[%s179_s26 + $0x18] sm:$0xff] (%p78_p3)  ;;  %v225_v2 = vld [vmem:[%s179_s26 + $0x30] sm:$0xff] (%p78_p3) }
  0x12   : > { %222 = vst [vmem:[%s173_s27] sm:$0xff] (%p78_p3), %v221_v0  ;;  %224 = vst [vmem:[%s173_s27 + $0x8] sm:$0xff] (%p78_p3), %v223_v1  ;;  %v227_v3 = vld [vmem:[%s179_s26 + $0x48] sm:$0xff] (%p78_p3)  ;;  %v229_v4 = vld [vmem:[%s179_s26 + $0x60] sm:$0xff] (%p78_p3) }
  0x13   : > { %226 = vst [vmem:[%s173_s27 + $0x10] sm:$0xff] (%p78_p3), %v225_v2  ;;  %v231_v5 = vld [vmem:[%s179_s26 + $0x78] sm:$0xff] (%p78_p3)  ;;  %228 = vst [vmem:[%s173_s27 + $0x18] sm:$0xff] (%p78_p3), %v227_v3  ;;  %v233_v6 = vld [vmem:[%s179_s26 + $0x90] sm:$0xff] (%p78_p3) }
  0x14   : > { %230 = vst [vmem:[%s173_s27 + $0x20] sm:$0xff] (%p78_p3), %v229_v4  ;;  %232 = vst [vmem:[%s173_s27 + $0x28] sm:$0xff] (%p78_p3), %v231_v5  ;;  %v235_v7 = vld [vmem:[%s179_s26 + $0xa8] sm:$0xff] (%p78_p3) }
  0x15   : > { %234 = vst [vmem:[%s173_s27 + $0x30] sm:$0xff] %v233_v6  ;;  %236 = vst [vmem:[%s173_s27 + $0x38] sm:$0xff] %v235_v7 }
  0x16 PF: > { %p575_p6 = scmp.ge.s32.totalorder %s683_s16, 1  ;;  %p249_p7 = scmp.lt.s32.totalorder %s683_s16, 4 }
  0x18   : > { %p250_p8 = pnand %p575_p6, %p249_p7 }
  0x19   : > { %s256_s28 = sand.u32 (!%p250_p8), 1, %s667_s12   ;;  %v685_v8 = vmov (!%p250_p8), 0   ;;  %v327_v17 = vld [vmem:[%s777_s0] sm:$0xff] (!%p250_p8)  ;;  %vm377_vm0 = vcmask (!%p250_p8), 523264   ;;  %s577_s6 = sshll.u32 (!%p250_p8), %s675_s14, 1  ;;  %v433_v19 = vlaneseq (!%p250_p8) }
  0x1a   : > { %253 = sbr.rel (%p250_p8) target bundleno = 261 (0x105), region = 66  ;;  %s576_s29 = sshll.u32 (!%p250_p8), %s256_s28, 6  ;;  %413 = vmatprep.mubr.bf16.mxu0 (!%p250_p8), %v685_v8  ;;  %v328_v18 = vpack.c.bf16 (!%p250_p8), %v327_v17, %v327_v17 }
  0x1b   : > { %s258_s30 = scalar_lea.vmem (!%p250_p8), [#allocation3], %s576_s29  ;;  %p304_p9 = scmp.lt.s32.totalorder (!%p250_p8), %s577_s6, 5  ;;  %v434_v20 = vshrl.u32 (!%p250_p8), %v433_v19, 7 }
  0x1c   : > { %v633_v9 = vld [vmem:[%s258_s30 + $0x4] ss:$8 sps:$4 sm:$0xff] (!%p250_p8)   ;;  %v635_v10 = vld [vmem:[%s258_s30] ss:$8 sps:$4 sm:$0xff] (!%p250_p8)   ;;  %v636_v11 = vld [vmem:[%s258_s30 + $0x14] ss:$8 sps:$4 sm:$0xff] (!%p250_p8)  }
  0x1d   : > { %381 = vmatprep.subr.bf16.mxu0 (!%p250_p8), %v633_v9  ;;  %v638_v12 = vld [vmem:[%s258_s30 + $0x10] ss:$8 sps:$4 sm:$0xff] (!%p250_p8)   ;;  %v639_v13 = vld [vmem:[%s258_s30 + $0x24] ss:$8 sps:$4 sm:$0xff] (!%p250_p8)   ;;  %v641_v14 = vld [vmem:[%s258_s30 + $0x20] ss:$8 sps:$4 sm:$0xff] (!%p250_p8)  }
  0x1e   : > { %382 = vmatpush1.bf16.msra.mxu0 (!%p250_p8), %v635_v10  ;;  %v642_v15 = vld [vmem:[%s258_s30 + $0x34] ss:$8 sps:$4 sm:$0xff] (!%p250_p8)   ;;  %v644_v16 = vld [vmem:[%s258_s30 + $0x30] ss:$8 sps:$4 sm:$0xff] (!%p250_p8)   ;;  %v435_v21 = vsub.s32 (!%p250_p8), 0, %v434_v20  ;;  %v439_v23 = vsub.s32 (!%p250_p8), 1, %v434_v20 }
  0x1f   : > { %383 = vmatprep.subr.bf16.mxu0 (!%p250_p8), %v636_v11 }
  0x21   : > { %s788_s6 = smov (!%p304_p9, %s577_s6), 5 }
  0x22   : > { %384 = vmatpush1.bf16.msra.mxu0 %v638_v12  ;;  %s306_s9 = scalar_lea.vmem %s779_s2, %s788_s6  ;;  %s579_s10 = sshll.u32 %s788_s6, 3 }
  0x23   : > { %385 = vmatprep.subr.bf16.mxu0 %v639_v13  ;;  %v431_v22 = vld [vmem:[%s306_s9] sm:$0x3]  ;;  %s316_s18 = scalar_lea.vmem %s780_s3, %s579_s10 }
  0x24   : > { %v436_v24 = vrot.slane %v431_v22, %v435_v21  ;;  %v440_v25 = vrot.slane %v431_v22, %v439_v23 }
  0x26   : > { %386 = vmatpush1.bf16.msra.mxu0 %v641_v14 }
  0x27   : > { %387 = vmatprep.subr.bf16.mxu0 %v642_v15 }
  0x2a   : > { %388 = vmatpush1.bf16.msra.mxu0 %v644_v16 }
  0x2d   : > { %588 = vmatmul.mubr.msk.bf16.vlgmr.msra.gmra.mrb[0].mxu0 %vm377_vm0, %v328_v18 }
 0x100   : > { %v415_v26 = vpop.f32.mrb[0].mxu0 }
 0x101   : > { %v443_v27 = vadd.f32 %v436_v24, %v415_v26  ;;  %v417_v28 = vpop.f32.mrb[1].mxu0 }
 0x102   : > { %v444_v29 = vadd.f32 %v440_v25, %v417_v28  ;;  %v419_v30 = vpop.f32.mrb[2].mxu0 }
 0x103   : > { %445 = vst [vmem:[%s316_s18] sm:$0xff] %v443_v27  ;;  %v420_v31 = vpop.f32.mrb[3].mxu0 }
 0x104   : > { %446 = vst [vmem:[%s316_s18 + $0x8] sm:$0xff] %v444_v29 }
 0x105 PF: > { %s13_s16 = sadd.s32 1, %s683_s16   ;;  %s781_s12 = smov %s671_s13 }
 0x106   : > { %p10_p10 = scmp.ge.s32.totalorder %s13_s16, 5   ;;  %s782_s13 = smov %s741_s20 }
 0x107   : > { %s783_s14 = smov %s679_s15  ;;  %s784_s15 = smov %s786_s17 }
 0x108   :  { %12 = sbr.rel (!%p10_p10) target bundleno = 3 (0x3), region = 119 }

// kernel: vit_gs_encoder_forward.21
= control target key start
LH: loop header
LB: loop body
LE: loop exit
PB: predicated region body
PF: predicated region fallthrough
CT: control target
= control target key end

     0   :  { %9 = vsyncpa [#allocation3], 0  ;;  %s606_s0 = inlined_call_operand.vmem [shape: f32[2,256], index: 0, kind: input, shape index: {}]   ;;  %s607_s1 = inlined_call_operand.vmem [shape: f32[2,4], index: 1, kind: input, shape index: {}]   ;;  %s608_s2 = inlined_call_operand.vmem [shape: f32[2,16], index: 2, kind: input, shape index: {}]   ;;  %s609_s3 = inlined_call_operand.vmem [shape: f32[2,1,256], index: 3, kind: input, shape index: {}]   ;;  %s610_s4 = inlined_call_operand.vmem [shape: f32[2,3,256], index: 4, kind: output, shape index: {}]  }
   0x1   :  { %10 = vsyncpa [#allocation5], 0  ;;  %s518_s15 = smov 0  }
   0x2 LB: > { %s524_s16 = sadd.s32 4294967295, %s489_s15   ;;  %p393_p0 = scmp.ge.s32.totalorder %s489_s15, 1  ;;  %s489_s15 = sphi %s518_s15, %s16_s15  }
   0x3   : > { %p136_p1 = scmp.lt.s32.totalorder %s489_s15, 3  ;;  %s152_s19 = sshll.u32 %s607_s1, 4  ;;  %s153_s19 = int_to_ptr.vmem [resolvable:$true] %s152_s19 }
   0x4   : > { %p611_p3 = scmp.eq.s32.totalorder %s524_s16, 0  ;;  %s163_s23 = sshll.u32 %s608_s2, 4  ;;  %s164_s23 = int_to_ptr.vmem [resolvable:$true] %s163_s23 }
   0x5   : > { %p531_p2 = pnand %p393_p0, %p136_p1  ;;  %s445_s25 = scalar_lea.vmem %s153_s19, 32 }
   0x6   : > { %p446_p6 = scmp.ne.s32.totalorder %s153_s19, %s445_s25  ;;  %p453_p10 = scmp.lt.s32.totalorder %s153_s19, %s153_s19 }
   0x7   : > { %s613_s20 = scalar_select %p531_p2, 1, 0 }
   0x8   : > { %p418_p4 = pneg %p531_p2  ;;  %p454_p11 = scmp.lt.s32.totalorder %s445_s25, %s445_s25 }
   0xa   : > { %p543_p5 = pnand %p611_p3, %p418_p4  ;;  %p455_p12 = por %p454_p11, %p453_p10 }
   0xc   : > { %p447_p7 = pneg %p543_p5 }
   0xe   : > { %p448_p8 = pnand %p447_p7, %p446_p6 }
  0x10   : > { %p449_p9 = pneg %p448_p8 }
  0x12   : > { %p456_p13 = pnand %p455_p12, %p449_p9 }
  0x14   : > { %459 = shalt.err (!%p456_p13)
}
  0x15   : > { %s491_s26 = smov [#allocation2]   ;;  %s460_s27 = scalar_lea.vmem %s164_s23, 32 }
  0x16   : > { %421 = dma.vmem_to_smem (!%p543_p5), %s153_s19, 32, %s491_s26, [#allocation3]  }
  0x17   : > { %p461_p0 = scmp.ne.s32.totalorder %s164_s23, %s460_s27  ;;  %p468_p3 = scmp.lt.s32.totalorder %s164_s23, %s164_s23 }
  0x18   : > { %p469_p2 = scmp.lt.s32.totalorder %s460_s27, %s460_s27 }
  0x19   : > { %p463_p1 = pnand %p461_p0, %p447_p7 }
  0x1a   : > { %p470_p6 = por %p469_p2, %p468_p3 }
  0x1b   : > { %p464_p4 = pneg %p463_p1 }
  0x1d   : > { %p471_p8 = pnand %p470_p6, %p464_p4 }
  0x1f   : > { %474 = shalt.err (!%p471_p8)
}
  0x20   : > { %s492_s28 = smov [#allocation4]   ;;  %p615_p9 = scmp.ne.s32.totalorder %s613_s20, 0 }
  0x21   : > { %424 = dma.vmem_to_smem (!%p543_p5), %s164_s23, 32, %s492_s28, [#allocation5]  }
  0x22   : > { %183 = sbr.rel (%p615_p9) target bundleno = 101 (0x65), region = 36  ;;  %p616_p10 = scmp.eq.s32.totalorder (!%p615_p9), %s524_s16, 0 }
  0x29   : > { %480 = dma.done.wait (%p616_p10), [#allocation3], 32   ;;  %p617_p11 = pmov %p616_p10 }
  0x2a   : > { %p618_p7 = pmov %p616_p10 }
  0x2b   : > { %482 = vsyncadd (%p617_p11), [#allocation3], 4294967264 }
  0x2c   : > { %484 = dma.done.wait (%p618_p7), [#allocation5], 32   ;;  %p619_p2 = pmov %p618_p7 }
  0x2e   : > { %486 = vsyncadd (%p619_p2), [#allocation5], 4294967264 }
  0x2f   : > { %193 = sfence }
  0x30   : > { %s564_s29 = sshll.u32 %s524_s16, 7  ;;  %v222_v1 = vld [vmem:[%s606_s0] ss:$2 sm:$0x3]  ;;  %p213_p3 = scmp.lt.s32.totalorder %s524_s16, 1  ;;  %v299_v42 = vlaneseq }
  0x31   : > { %s226_s30 = sld [smem:[#allocation2 + %s564_s29]]  ;;  %s227_s5 = sadd.s32 1, %s564_s29  ;;  %v403_v3 = vld [vmem:[%s606_s0 + $0x1] ss:$2 sm:$0x3]  ;;  %v233_v4 = vadd.f32 0.5, %v222_v1 }
  0x32   : > { %s228_s6 = sld [smem:[#allocation2 + %s227_s5]]  ;;  %s229_s7 = sadd.s32 2, %s564_s29  ;;  %v239_v6 = vadd.f32 0.5, %v403_v3  ;;  %vm301_vm0 = vcmp.lt.s32.totalorder %v299_v42, 256 }
  0x33   : > { %s230_s8 = sld [smem:[#allocation2 + %s229_s7]]  ;;  %s231_s9 = sadd.s32 3, %s564_s29 }
  0x34   : > { %s232_s10 = sld [smem:[#allocation2 + %s231_s9]]  ;;  %s255_s14 = sadd.s32 4, %s564_s29 }
  0x35   : > { %s576_s13 = sld [smem:[#allocation4 + %s564_s29]]  ;;  %s259_s17 = sadd.s32 5, %s564_s29 }
  0x36   : > { %s583_s20 = sld [smem:[#allocation4 + %s227_s5]]  ;;  %s268_s23 = sadd.s32 8, %s564_s29 }
  0x37   : > { %v236_v0 = vstv %s226_s30  ;;  %s256_s21 = sld [smem:[#allocation4 + %s255_s14]]  ;;  %s264_s24 = sadd.s32 6, %s564_s29 }
  0x38   : > { %439 = vrcp.f32 %v236_v0  ;;  %v242_v2 = vstv %s228_s6  ;;  %s260_s22 = sld [smem:[#allocation4 + %s259_s17]]  ;;  %s272_s26 = sadd.s32 9, %s564_s29 }
  0x39   : > { %441 = vrcp.f32 %v242_v2  ;;  %v234_v5 = vstv %s230_s8  ;;  %s269_s25 = sld [smem:[#allocation4 + %s268_s23]]  ;;  %s277_s27 = sadd.s32 10, %s564_s29 }
  0x3a   : > { %v240_v7 = vstv %s232_s10  ;;  %s273_s28 = sld [smem:[#allocation4 + %s272_s26]]  ;;  %v235_v8 = vsub.f32 %v233_v4, %v234_v5  ;;  %s621_s16 = smov (!%p213_p3, %s524_s16), 1 }
  0x3b   : > { %s252_s30 = sld [smem:[#allocation4 + %s229_s7]]  ;;  %v241_v9 = vsub.f32 %v239_v6, %v240_v7  ;;  %v246_v11 = vstv %s576_s13  ;;  %s291_s5 = sadd.s32 7, %s564_s29 }
  0x3c   : > { %s265_s6 = sld [smem:[#allocation4 + %s264_s24]]  ;;  %v249_v16 = vstv %s583_s20  ;;  %s293_s7 = sadd.s32 11, %s564_s29 }
  0x3d   : > { %s278_s11 = sld [smem:[#allocation4 + %s277_s27]]  ;;  %v257_v12 = vstv %s256_s21  ;;  %s400_s8 = sshll.u32 %s621_s16, 1 }
  0x3e   : > { %v261_v17 = vstv %s260_s22  ;;  %s290_s10 = sld [smem:[#allocation4 + %s231_s9]]  ;;  %s216_s18 = scalar_lea.vmem %s609_s3, %s400_s8 }
  0x3f   : > { %v270_v13 = vstv %s269_s25  ;;  %s292_s12 = sld [smem:[#allocation4 + %s291_s5]]  ;;  %v295_v41 = vld [vmem:[%s216_s18] sm:$0x3]  ;;  %s409_s19 = sshll.u32 %s621_s16, 3 }
  0x40   : > { %v274_v18 = vstv %s273_s28  ;;  %s294_s13 = sld [smem:[#allocation4 + %s293_s7]]  ;;  %s221_s20 = scalar_lea.vmem %s610_s4, %s409_s19 }
  0x41   : > { %v253_v26 = vstv %s252_s30 }
  0x42   : > { %v440_v10 = vpop.eup %439  ;;  %v266_v27 = vstv %s265_s6 }
  0x43   : > { %v238_v14 = vmul.f32 %v440_v10, %v235_v8  ;;  %v442_v15 = vpop.eup %441  ;;  %v279_v28 = vstv %s278_s11 }
  0x44   : > { %v244_v19 = vmul.f32 %v442_v15, %v241_v9  ;;  %v297_v46 = vstv %s290_s10 }
  0x45   : > { %v247_v20 = vmul.f32 %v246_v11, %v238_v14  ;;  %v258_v21 = vmul.f32 %v257_v12, %v238_v14  ;;  %v271_v22 = vmul.f32 %v270_v13, %v238_v14  ;;  %v305_v47 = vstv %s292_s12 }
  0x46   : > { %v250_v23 = vmul.f32 %v249_v16, %v244_v19  ;;  %v262_v24 = vmul.f32 %v261_v17, %v244_v19  ;;  %v275_v25 = vmul.f32 %v274_v18, %v244_v19  ;;  %v310_v48 = vstv %s294_s13 }
  0x48   : > { %v251_v29 = vadd.f32 %v250_v23, %v247_v20  ;;  %v263_v30 = vadd.f32 %v262_v24, %v258_v21  ;;  %v276_v31 = vadd.f32 %v275_v25, %v271_v22 }
  0x4a   : > { %v254_v32 = vadd.f32 %v253_v26, %v251_v29  ;;  %v267_v33 = vadd.f32 %v266_v27, %v263_v30  ;;  %v280_v34 = vadd.f32 %v279_v28, %v276_v31 }
  0x4c   : > { %v281_v35 = vmul.f32 %v254_v32, %v254_v32  ;;  %v282_v36 = vmul.f32 %v267_v33, %v267_v33  ;;  %v284_v37 = vmul.f32 %v280_v34, %v280_v34 }
  0x4e   : > { %v283_v38 = vadd.f32 %v282_v36, %v281_v35 }
  0x50   : > { %v285_v39 = vadd.f32 %v284_v37, %v283_v38 }
  0x52   : > { %443 = vrsqrt.f32 %v285_v39 }
  0x5c   : > { %v444_v40 = vpop.eup %443 }
  0x5d   : > { %v287_v43 = vmul.f32 %v444_v40, %v254_v32  ;;  %v288_v44 = vmul.f32 %v444_v40, %v267_v33  ;;  %v289_v45 = vmul.f32 %v444_v40, %v280_v34 }
  0x5f   : > { %v296_v49 = vmul.f32 %v295_v41, %v287_v43  ;;  %v304_v50 = vmul.f32 %v295_v41, %v288_v44  ;;  %v309_v51 = vmul.f32 %v295_v41, %v289_v45 }
  0x61   : > { %v298_v52 = vadd.f32 %v297_v46, %v296_v49  ;;  %v306_v53 = vadd.f32 %v305_v47, %v304_v50  ;;  %v311_v54 = vadd.f32 %v310_v48, %v309_v51 }
  0x63   : > { %303 = vst.msk [vmem:[%s221_s20] ss:$4 sm:$0x3] %vm301_vm0, %v298_v52  ;;  %405 = vst.msk [vmem:[%s221_s20 + $0x1] ss:$4 sm:$0x3] %vm301_vm0, %v306_v53 }
  0x64   : > { %406 = vst.msk [vmem:[%s221_s20 + $0x2] ss:$4 sm:$0x3] %vm301_vm0, %v311_v54 }
  0x65 PF: > { %s16_s15 = sadd.s32 1, %s489_s15  }
  0x66   : > { %p13_p5 = scmp.ge.s32.totalorder %s16_s15, 4  }
  0x68   :  { %15 = sbr.rel (!%p13_p5) target bundleno = 2 (0x2), region = 78 }
  0x6f   :  { %335 = vsyncpa [#allocation3], 1 }
  0x70   :  { %337 = vsyncpa [#allocation3 + $0x1], 1 }
  0x71   :  { %338 = vsyncpa [#allocation5], 1 }

</bundles_post_ra>
